<compile_context>
chip_gen: v7x
topology: tpu7x:2x2x1
jax: 0.10.0
libtpu: 0.0.40
codegen_flags: <defaults>
</compile_context>

<pallas_src>
import jax
import jax.numpy as jnp
from jax.experimental import pallas as pl
from jax.experimental.pallas import tpu as pltpu

INPUT_SIZE = 32
D_MODEL = 32
NUM_LAYERS = 2
NUM_CLASSES = 7
LN_EPS = 1e-5
C_PAD = 128          # lane-dense padded class dim
B_BLK = 16           # samples per grid step (multiple of 8)


def _mamba_classifier_kernel(
    x_ref,              # VMEM (B_BLK, T, F)
    len_ref,            # VMEM (B_BLK, 1) int32
    wp_ref, bp_ref,     # (F, D), (1, D)        input_proj
    win_ref, bin_ref,   # (L, D, D), (L, 1, D)  block.in_proj
    wbc_ref, bbc_ref,   # (L, D, D), (L, 1, D)  fused I + s_B + s_C
    wo_ref, bo_ref,     # (L, D, D), (L, 1, D)  block.out_proj
    g_ref, be_ref,      # (L, 1, D), (L, 1, D)  block.norm gamma/beta
    wfc_ref, bfc_ref,   # (D, C_PAD), (1, C_PAD) fc (zero-padded to 128 lanes)
    out_ref,            # VMEM (B_BLK, C_PAD)
):
    Bb, T, F = x_ref.shape
    D = wp_ref.shape[1]

    # Flatten the batch block so every matmul has M = B_BLK*T rows (>= 128).
    x = x_ref[...].reshape(Bb * T, F)

    # input_proj
    h = jnp.dot(x, wp_ref[...], preferred_element_type=jnp.float32) + bp_ref[...]

    # CustomMambaBlock x NUM_LAYERS (static unroll; NUM_LAYERS is small)
    for l in range(NUM_LAYERS):
        h_in = h
        z = jnp.dot(h, win_ref[l], preferred_element_type=jnp.float32) + bin_ref[l]
        # fused: relu(z + s_B(z) + s_C(z)) == relu(z @ (I+Wb+Wc) + (bb+bc))
        z = jnp.maximum(
            jnp.dot(z, wbc_ref[l], preferred_element_type=jnp.float32) + bbc_ref[l],
            0.0,
        )
        z = jnp.dot(z, wo_ref[l], preferred_element_type=jnp.float32) + bo_ref[l]
        # TODO(synk): nn.Dropout omitted — eval-mode identity.
        y = z + h_in
        mu = jnp.mean(y, axis=-1, keepdims=True)
        var = jnp.mean((y - mu) ** 2, axis=-1, keepdims=True)   # biased, like torch LN
        h = (y - mu) * jax.lax.rsqrt(var + LN_EPS) * g_ref[l] + be_ref[l]

    # Masked mean pooling over the first lengths[b] timesteps (zeros if length == 0)
    h3 = h.reshape(Bb, T, D)
    lens = len_ref[...]                                          # (Bb, 1) int32
    t_idx = jax.lax.broadcasted_iota(jnp.int32, (Bb, T), 1)
    mask = (t_idx < lens).astype(jnp.float32)                    # (Bb, T)
    s = jnp.sum(h3 * mask[:, :, None], axis=1)                   # (Bb, D)
    denom = jnp.maximum(lens, 1).astype(jnp.float32)             # (Bb, 1)
    pooled = s * pl.reciprocal(denom, approx=True)
    pooled = jnp.where(lens > 0, pooled, 0.0)

    # Final classifier head (lane-dense padded to C_PAD); zero pooled -> bias only,
    # which matches the PyTorch reference for length == 0.
    logits = jnp.dot(pooled, wfc_ref[...], preferred_element_type=jnp.float32) + bfc_ref[...]
    out_ref[...] = logits


def mamba_classifier_forward(x, lengths, params, *, b_blk=B_BLK):
    """x: (B, T, INPUT_SIZE) f32, lengths: (B,) int32 -> logits (B, NUM_CLASSES)."""
    assert b_blk % 8 == 0
    B, T, F = x.shape
    D = params["wp"].shape[1]
    C = params["wfc"].shape[1]

    # Host-side algebraic fusion of the s_B / s_C branches.
    eye = jnp.eye(D, dtype=jnp.float32)
    wbc = params["wb"] + params["wc"] + eye[None]
    bbc = params["bb"] + params["bc"]

    # Lane-dense classifier head: pad class dim to 128.
    wfc_pad = jnp.zeros((D, C_PAD), jnp.float32).at[:, :C].set(params["wfc"])
    bfc_pad = jnp.zeros((1, C_PAD), jnp.float32).at[:, :C].set(params["bfc"])

    # Pad batch to a multiple of b_blk; padded samples get length 0 (harmless).
    b_pad = pl.cdiv(B, b_blk) * b_blk
    if b_pad != B:
        x = jnp.pad(x, ((0, b_pad - B), (0, 0), (0, 0)))
        lengths = jnp.pad(lengths, (0, b_pad - B))
    lens2d = lengths.reshape(b_pad, 1).astype(jnp.int32)

    param_list = [
        params["wp"], params["bp"],
        params["win"], params["bin"],
        wbc, bbc,
        params["wo"], params["bo"],
        params["g"], params["be"],
        wfc_pad, bfc_pad,
    ]
    # Small constants: keep whole arrays resident in VMEM, no per-step blocking.
    const_specs = [pl.BlockSpec(memory_space=pltpu.MemorySpace.VMEM)
                   for _ in param_list]

    out = pl.pallas_call(
        _mamba_classifier_kernel,
        out_shape=jax.ShapeDtypeStruct((b_pad, C_PAD), jnp.float32),
        grid=(b_pad // b_blk,),
        in_specs=[pl.BlockSpec((b_blk, T, F), lambda i: (i, 0, 0)),
                  pl.BlockSpec((b_blk, 1), lambda i: (i, 0))]
                 + const_specs,
        out_specs=pl.BlockSpec((b_blk, C_PAD), lambda i: (i, 0)),
        compiler_params=pltpu.CompilerParams(dimension_semantics=("parallel",)),
    )(x, lens2d, *param_list)
    return out[:B, :C]


def init_params(key):
    """Deterministic synthetic parameter init (shapes from the module __init__)."""
    def lin(k, fan_in, fan_out):
        k1, k2 = jax.random.split(k)
        w = jax.random.normal(k1, (fan_in, fan_out), jnp.float32) / jnp.sqrt(fan_in)
        b = jax.random.normal(k2, (1, fan_out), jnp.float32) * 0.01
        return w, b

    keys = jax.random.split(key, 8)
    wp, bp = lin(keys[0], INPUT_SIZE, D_MODEL)

    def stacked(kbase):
        ws, bs = [], []
        for l in range(NUM_LAYERS):
            w, b = lin(jax.random.fold_in(kbase, l), D_MODEL, D_MODEL)
            ws.append(w)
            bs.append(b)
        return jnp.stack(ws, 0), jnp.stack(bs, 0)   # (L,D,D), (L,1,D)

    win, bin_ = stacked(keys[1])
    wb, bb = stacked(keys[2])
    wc, bc = stacked(keys[3])
    wo, bo = stacked(keys[4])
    g = 1.0 + 0.05 * jax.random.normal(keys[5], (NUM_LAYERS, 1, D_MODEL), jnp.float32)
    be = 0.05 * jax.random.normal(keys[6], (NUM_LAYERS, 1, D_MODEL), jnp.float32)
    wfc, bfc = lin(keys[7], D_MODEL, NUM_CLASSES)
    return dict(wp=wp, bp=bp, win=win, bin=bin_, wb=wb, bb=bb, wc=wc, bc=bc,
                wo=wo, bo=bo, g=g, be=be, wfc=wfc, bfc=bfc)


def reference_forward(x, lengths, p):
    """Pure-JAX reference reproducing the PyTorch semantics (eval mode)."""
    h = x @ p["wp"] + p["bp"]
    for l in range(NUM_LAYERS):
        h_in = h
        z = h @ p["win"][l] + p["bin"][l]
        zb = z @ p["wb"][l] + p["bb"][l]
        zc = z @ p["wc"][l] + p["bc"][l]
        z = jnp.maximum(z + zb + zc, 0.0)
        z = z @ p["wo"][l] + p["bo"][l]
        y = z + h_in
        mu = y.mean(-1, keepdims=True)
        var = ((y - mu) ** 2).mean(-1, keepdims=True)
        h = (y - mu) / jnp.sqrt(var + LN_EPS) * p["g"][l] + p["be"][l]
    B, T, D = h.shape
    mask = (jnp.arange(T)[None, :, None] < lengths[:, None, None]).astype(jnp.float32)
    s = (h * mask).sum(1)
    denom = jnp.maximum(lengths, 1).astype(jnp.float32)[:, None]
    pooled = jnp.where((lengths > 0)[:, None], s / denom, 0.0)
    return pooled @ p["wfc"] + p["bfc"]


if __name__ == "__main__":
    key = jax.random.PRNGKey(0)
    kx, kl, kp = jax.random.split(key, 3)

    B, T = 20, 8   # exercises batch blocking, batch padding, and a 2-step grid
    x = jax.random.normal(kx, (B, T, INPUT_SIZE), jnp.float32)
    lengths = jax.random.randint(kl, (B,), 0, T + 1).astype(jnp.int32)
    lengths = lengths.at[1].set(0)   # make sure the length==0 branch is covered
    params = init_params(kp)

    logits = mamba_classifier_forward(x, lengths, params)
    logits = jax.block_until_ready(logits)

    ref = jax.block_until_ready(reference_forward(x, lengths, params))
    assert logits.shape == (B, NUM_CLASSES)
    assert jnp.allclose(logits, ref, atol=1e-3, rtol=1e-3), (logits, ref)

    print("KERNEL_OK")
</pallas_src>

<mosaic_0001>
module attributes {stable_mosaic.version = 11 : i64} {
  func.func @_mamba_classifier_kernel(%arg0: i32, %arg1: memref<16x8x32xf32, #tpu.memory_space<vmem>>, %arg2: memref<16x1xi32, #tpu.memory_space<vmem>>, %arg3: memref<32x32xf32, #tpu.memory_space<vmem>>, %arg4: memref<1x32xf32, #tpu.memory_space<vmem>>, %arg5: memref<2x32x32xf32, #tpu.memory_space<vmem>>, %arg6: memref<2x1x32xf32, #tpu.memory_space<vmem>>, %arg7: memref<2x32x32xf32, #tpu.memory_space<vmem>>, %arg8: memref<2x1x32xf32, #tpu.memory_space<vmem>>, %arg9: memref<2x32x32xf32, #tpu.memory_space<vmem>>, %arg10: memref<2x1x32xf32, #tpu.memory_space<vmem>>, %arg11: memref<2x1x32xf32, #tpu.memory_space<vmem>>, %arg12: memref<2x1x32xf32, #tpu.memory_space<vmem>>, %arg13: memref<32x128xf32, #tpu.memory_space<vmem>>, %arg14: memref<1x128xf32, #tpu.memory_space<vmem>>, %arg15: memref<16x128xf32, #tpu.memory_space<vmem>>) attributes {dimension_semantics = [#tpu.dimension_semantics<parallel>], iteration_bounds = array<i64: 2>, scalar_prefetch = 0 : i64, scratch_operands = 0 : i64, tpu.core_type = #tpu.core_type<tc>, window_params = [{transform_indices = @transform_0, window_bounds = array<i64: 16, 8, 32>}, {transform_indices = @transform_1, window_bounds = array<i64: 16, 1>}, {pipeline_mode = #tpu.pipeline_mode<synchronous>, transform_indices = @transform_2, window_bounds = array<i64: 32, 32>}, {pipeline_mode = #tpu.pipeline_mode<synchronous>, transform_indices = @transform_3, window_bounds = array<i64: 1, 32>}, {pipeline_mode = #tpu.pipeline_mode<synchronous>, transform_indices = @transform_4, window_bounds = array<i64: 2, 32, 32>}, {pipeline_mode = #tpu.pipeline_mode<synchronous>, transform_indices = @transform_5, window_bounds = array<i64: 2, 1, 32>}, {pipeline_mode = #tpu.pipeline_mode<synchronous>, transform_indices = @transform_6, window_bounds = array<i64: 2, 32, 32>}, {pipeline_mode = #tpu.pipeline_mode<synchronous>, transform_indices = @transform_7, window_bounds = array<i64: 2, 1, 32>}, {pipeline_mode = #tpu.pipeline_mode<synchronous>, transform_indices = @transform_8, window_bounds = array<i64: 2, 32, 32>}, {pipeline_mode = #tpu.pipeline_mode<synchronous>, transform_indices = @transform_9, window_bounds = array<i64: 2, 1, 32>}, {pipeline_mode = #tpu.pipeline_mode<synchronous>, transform_indices = @transform_10, window_bounds = array<i64: 2, 1, 32>}, {pipeline_mode = #tpu.pipeline_mode<synchronous>, transform_indices = @transform_11, window_bounds = array<i64: 2, 1, 32>}, {pipeline_mode = #tpu.pipeline_mode<synchronous>, transform_indices = @transform_12, window_bounds = array<i64: 32, 128>}, {pipeline_mode = #tpu.pipeline_mode<synchronous>, transform_indices = @transform_13, window_bounds = array<i64: 1, 128>}, {transform_indices = @transform_14, window_bounds = array<i64: 16, 128>}]} {
    %c0 = arith.constant 0 : index
    %c0_0 = arith.constant 0 : index
    %c0_1 = arith.constant 0 : index
    %0 = vector.load %arg1[%c0, %c0_0, %c0_1] : memref<16x8x32xf32, #tpu.memory_space<vmem>>, vector<16x8x32xf32>
    %1 = vector.shape_cast %0 : vector<16x8x32xf32> to vector<128x32xf32>
    %c0_2 = arith.constant 0 : index
    %c0_3 = arith.constant 0 : index
    %2 = vector.load %arg3[%c0_2, %c0_3] : memref<32x32xf32, #tpu.memory_space<vmem>>, vector<32x32xf32>
    %cst = arith.constant dense<0.000000e+00> : vector<128x32xf32>
    %3 = tpu.matmul %1, %2, %cst {dimension_numbers = #tpu.dot_dimension_numbers<[1], [0], [0], [1], [0, 0, 1, 1], [], []>} : vector<128x32xf32>, vector<32x32xf32>, vector<128x32xf32> -> vector<128x32xf32>
    %c0_4 = arith.constant 0 : index
    %c0_5 = arith.constant 0 : index
    %4 = vector.load %arg4[%c0_4, %c0_5] : memref<1x32xf32, #tpu.memory_space<vmem>>, vector<1x32xf32>
    %5 = vector.broadcast %4 : vector<1x32xf32> to vector<128x32xf32>
    %6 = arith.addf %3, %5 : vector<128x32xf32>
    %c0_6 = arith.constant 0 : index
    %c0_7 = arith.constant 0 : index
    %c0_8 = arith.constant 0 : index
    %7 = vector.load %arg5[%c0_6, %c0_7, %c0_8] : memref<2x32x32xf32, #tpu.memory_space<vmem>>, vector<1x32x32xf32>
    %8 = vector.shape_cast %7 : vector<1x32x32xf32> to vector<32x32xf32>
    %cst_9 = arith.constant dense<0.000000e+00> : vector<128x32xf32>
    %9 = tpu.matmul %6, %8, %cst_9 {dimension_numbers = #tpu.dot_dimension_numbers<[1], [0], [0], [1], [0, 0, 1, 1], [], []>} : vector<128x32xf32>, vector<32x32xf32>, vector<128x32xf32> -> vector<128x32xf32>
    %c0_10 = arith.constant 0 : index
    %c0_11 = arith.constant 0 : index
    %c0_12 = arith.constant 0 : index
    %10 = vector.load %arg6[%c0_10, %c0_11, %c0_12] : memref<2x1x32xf32, #tpu.memory_space<vmem>>, vector<1x1x32xf32>
    %11 = vector.shape_cast %10 : vector<1x1x32xf32> to vector<1x32xf32>
    %12 = vector.broadcast %11 : vector<1x32xf32> to vector<128x32xf32>
    %13 = arith.addf %9, %12 : vector<128x32xf32>
    %c0_13 = arith.constant 0 : index
    %c0_14 = arith.constant 0 : index
    %c0_15 = arith.constant 0 : index
    %14 = vector.load %arg7[%c0_13, %c0_14, %c0_15] : memref<2x32x32xf32, #tpu.memory_space<vmem>>, vector<1x32x32xf32>
    %15 = vector.shape_cast %14 : vector<1x32x32xf32> to vector<32x32xf32>
    %cst_16 = arith.constant dense<0.000000e+00> : vector<128x32xf32>
    %16 = tpu.matmul %13, %15, %cst_16 {dimension_numbers = #tpu.dot_dimension_numbers<[1], [0], [0], [1], [0, 0, 1, 1], [], []>} : vector<128x32xf32>, vector<32x32xf32>, vector<128x32xf32> -> vector<128x32xf32>
    %c0_17 = arith.constant 0 : index
    %c0_18 = arith.constant 0 : index
    %c0_19 = arith.constant 0 : index
    %17 = vector.load %arg8[%c0_17, %c0_18, %c0_19] : memref<2x1x32xf32, #tpu.memory_space<vmem>>, vector<1x1x32xf32>
    %18 = vector.shape_cast %17 : vector<1x1x32xf32> to vector<1x32xf32>
    %19 = vector.broadcast %18 : vector<1x32xf32> to vector<128x32xf32>
    %20 = arith.addf %16, %19 : vector<128x32xf32>
    %cst_20 = arith.constant 0.000000e+00 : f32
    %21 = vector.broadcast %cst_20 : f32 to vector<128x32xf32>
    %22 = arith.maximumf %20, %21 : vector<128x32xf32>
    %c0_21 = arith.constant 0 : index
    %c0_22 = arith.constant 0 : index
    %c0_23 = arith.constant 0 : index
    %23 = vector.load %arg9[%c0_21, %c0_22, %c0_23] : memref<2x32x32xf32, #tpu.memory_space<vmem>>, vector<1x32x32xf32>
    %24 = vector.shape_cast %23 : vector<1x32x32xf32> to vector<32x32xf32>
    %cst_24 = arith.constant dense<0.000000e+00> : vector<128x32xf32>
    %25 = tpu.matmul %22, %24, %cst_24 {dimension_numbers = #tpu.dot_dimension_numbers<[1], [0], [0], [1], [0, 0, 1, 1], [], []>} : vector<128x32xf32>, vector<32x32xf32>, vector<128x32xf32> -> vector<128x32xf32>
    %c0_25 = arith.constant 0 : index
    %c0_26 = arith.constant 0 : index
    %c0_27 = arith.constant 0 : index
    %26 = vector.load %arg10[%c0_25, %c0_26, %c0_27] : memref<2x1x32xf32, #tpu.memory_space<vmem>>, vector<1x1x32xf32>
    %27 = vector.shape_cast %26 : vector<1x1x32xf32> to vector<1x32xf32>
    %28 = vector.broadcast %27 : vector<1x32xf32> to vector<128x32xf32>
    %29 = arith.addf %25, %28 : vector<128x32xf32>
    %30 = arith.addf %29, %6 : vector<128x32xf32>
    %cst_28 = arith.constant dense<0.000000e+00> : vector<128xf32>
    %31 = vector.multi_reduction <add>, %30, %cst_28 [1] : vector<128x32xf32> to vector<128xf32>
    %32 = vector.shape_cast %31 : vector<128xf32> to vector<128x1xf32>
    %cst_29 = arith.constant 3.200000e+01 : f32
    %33 = vector.broadcast %cst_29 : f32 to vector<128x1xf32>
    %34 = arith.divf %32, %33 : vector<128x1xf32>
    %35 = vector.broadcast %34 : vector<128x1xf32> to vector<128x32xf32>
    %36 = arith.subf %30, %35 : vector<128x32xf32>
    %37 = arith.mulf %36, %36 : vector<128x32xf32>
    %cst_30 = arith.constant dense<0.000000e+00> : vector<128xf32>
    %38 = vector.multi_reduction <add>, %37, %cst_30 [1] : vector<128x32xf32> to vector<128xf32>
    %39 = vector.shape_cast %38 : vector<128xf32> to vector<128x1xf32>
    %cst_31 = arith.constant 3.200000e+01 : f32
    %40 = vector.broadcast %cst_31 : f32 to vector<128x1xf32>
    %41 = arith.divf %39, %40 : vector<128x1xf32>
    %42 = vector.broadcast %34 : vector<128x1xf32> to vector<128x32xf32>
    %43 = arith.subf %30, %42 : vector<128x32xf32>
    %cst_32 = arith.constant 9.99999974E-6 : f32
    %44 = vector.broadcast %cst_32 : f32 to vector<128x1xf32>
    %45 = arith.addf %41, %44 : vector<128x1xf32>
    %46 = math.rsqrt %45 : vector<128x1xf32>
    %47 = vector.broadcast %46 : vector<128x1xf32> to vector<128x32xf32>
    %48 = arith.mulf %43, %47 : vector<128x32xf32>
    %c0_33 = arith.constant 0 : index
    %c0_34 = arith.constant 0 : index
    %c0_35 = arith.constant 0 : index
    %49 = vector.load %arg11[%c0_33, %c0_34, %c0_35] : memref<2x1x32xf32, #tpu.memory_space<vmem>>, vector<1x1x32xf32>
    %50 = vector.shape_cast %49 : vector<1x1x32xf32> to vector<1x32xf32>
    %51 = vector.broadcast %50 : vector<1x32xf32> to vector<128x32xf32>
    %52 = arith.mulf %48, %51 : vector<128x32xf32>
    %c0_36 = arith.constant 0 : index
    %c0_37 = arith.constant 0 : index
    %c0_38 = arith.constant 0 : index
    %53 = vector.load %arg12[%c0_36, %c0_37, %c0_38] : memref<2x1x32xf32, #tpu.memory_space<vmem>>, vector<1x1x32xf32>
    %54 = vector.shape_cast %53 : vector<1x1x32xf32> to vector<1x32xf32>
    %55 = vector.broadcast %54 : vector<1x32xf32> to vector<128x32xf32>
    %56 = arith.addf %52, %55 : vector<128x32xf32>
    %c1 = arith.constant 1 : index
    %c0_39 = arith.constant 0 : index
    %c0_40 = arith.constant 0 : index
    %57 = vector.load %arg5[%c1, %c0_39, %c0_40] : memref<2x32x32xf32, #tpu.memory_space<vmem>>, vector<1x32x32xf32>
    %58 = vector.shape_cast %57 : vector<1x32x32xf32> to vector<32x32xf32>
    %cst_41 = arith.constant dense<0.000000e+00> : vector<128x32xf32>
    %59 = tpu.matmul %56, %58, %cst_41 {dimension_numbers = #tpu.dot_dimension_numbers<[1], [0], [0], [1], [0, 0, 1, 1], [], []>} : vector<128x32xf32>, vector<32x32xf32>, vector<128x32xf32> -> vector<128x32xf32>
    %c1_42 = arith.constant 1 : index
    %c0_43 = arith.constant 0 : index
    %c0_44 = arith.constant 0 : index
    %60 = vector.load %arg6[%c1_42, %c0_43, %c0_44] : memref<2x1x32xf32, #tpu.memory_space<vmem>>, vector<1x1x32xf32>
    %61 = vector.shape_cast %60 : vector<1x1x32xf32> to vector<1x32xf32>
    %62 = vector.broadcast %61 : vector<1x32xf32> to vector<128x32xf32>
    %63 = arith.addf %59, %62 : vector<128x32xf32>
    %c1_45 = arith.constant 1 : index
    %c0_46 = arith.constant 0 : index
    %c0_47 = arith.constant 0 : index
    %64 = vector.load %arg7[%c1_45, %c0_46, %c0_47] : memref<2x32x32xf32, #tpu.memory_space<vmem>>, vector<1x32x32xf32>
    %65 = vector.shape_cast %64 : vector<1x32x32xf32> to vector<32x32xf32>
    %cst_48 = arith.constant dense<0.000000e+00> : vector<128x32xf32>
    %66 = tpu.matmul %63, %65, %cst_48 {dimension_numbers = #tpu.dot_dimension_numbers<[1], [0], [0], [1], [0, 0, 1, 1], [], []>} : vector<128x32xf32>, vector<32x32xf32>, vector<128x32xf32> -> vector<128x32xf32>
    %c1_49 = arith.constant 1 : index
    %c0_50 = arith.constant 0 : index
    %c0_51 = arith.constant 0 : index
    %67 = vector.load %arg8[%c1_49, %c0_50, %c0_51] : memref<2x1x32xf32, #tpu.memory_space<vmem>>, vector<1x1x32xf32>
    %68 = vector.shape_cast %67 : vector<1x1x32xf32> to vector<1x32xf32>
    %69 = vector.broadcast %68 : vector<1x32xf32> to vector<128x32xf32>
    %70 = arith.addf %66, %69 : vector<128x32xf32>
    %cst_52 = arith.constant 0.000000e+00 : f32
    %71 = vector.broadcast %cst_52 : f32 to vector<128x32xf32>
    %72 = arith.maximumf %70, %71 : vector<128x32xf32>
    %c1_53 = arith.constant 1 : index
    %c0_54 = arith.constant 0 : index
    %c0_55 = arith.constant 0 : index
    %73 = vector.load %arg9[%c1_53, %c0_54, %c0_55] : memref<2x32x32xf32, #tpu.memory_space<vmem>>, vector<1x32x32xf32>
    %74 = vector.shape_cast %73 : vector<1x32x32xf32> to vector<32x32xf32>
    %cst_56 = arith.constant dense<0.000000e+00> : vector<128x32xf32>
    %75 = tpu.matmul %72, %74, %cst_56 {dimension_numbers = #tpu.dot_dimension_numbers<[1], [0], [0], [1], [0, 0, 1, 1], [], []>} : vector<128x32xf32>, vector<32x32xf32>, vector<128x32xf32> -> vector<128x32xf32>
    %c1_57 = arith.constant 1 : index
    %c0_58 = arith.constant 0 : index
    %c0_59 = arith.constant 0 : index
    %76 = vector.load %arg10[%c1_57, %c0_58, %c0_59] : memref<2x1x32xf32, #tpu.memory_space<vmem>>, vector<1x1x32xf32>
    %77 = vector.shape_cast %76 : vector<1x1x32xf32> to vector<1x32xf32>
    %78 = vector.broadcast %77 : vector<1x32xf32> to vector<128x32xf32>
    %79 = arith.addf %75, %78 : vector<128x32xf32>
    %80 = arith.addf %79, %56 : vector<128x32xf32>
    %cst_60 = arith.constant dense<0.000000e+00> : vector<128xf32>
    %81 = vector.multi_reduction <add>, %80, %cst_60 [1] : vector<128x32xf32> to vector<128xf32>
    %82 = vector.shape_cast %81 : vector<128xf32> to vector<128x1xf32>
    %cst_61 = arith.constant 3.200000e+01 : f32
    %83 = vector.broadcast %cst_61 : f32 to vector<128x1xf32>
    %84 = arith.divf %82, %83 : vector<128x1xf32>
    %85 = vector.broadcast %84 : vector<128x1xf32> to vector<128x32xf32>
    %86 = arith.subf %80, %85 : vector<128x32xf32>
    %87 = arith.mulf %86, %86 : vector<128x32xf32>
    %cst_62 = arith.constant dense<0.000000e+00> : vector<128xf32>
    %88 = vector.multi_reduction <add>, %87, %cst_62 [1] : vector<128x32xf32> to vector<128xf32>
    %89 = vector.shape_cast %88 : vector<128xf32> to vector<128x1xf32>
    %cst_63 = arith.constant 3.200000e+01 : f32
    %90 = vector.broadcast %cst_63 : f32 to vector<128x1xf32>
    %91 = arith.divf %89, %90 : vector<128x1xf32>
    %92 = vector.broadcast %84 : vector<128x1xf32> to vector<128x32xf32>
    %93 = arith.subf %80, %92 : vector<128x32xf32>
    %cst_64 = arith.constant 9.99999974E-6 : f32
    %94 = vector.broadcast %cst_64 : f32 to vector<128x1xf32>
    %95 = arith.addf %91, %94 : vector<128x1xf32>
    %96 = math.rsqrt %95 : vector<128x1xf32>
    %97 = vector.broadcast %96 : vector<128x1xf32> to vector<128x32xf32>
    %98 = arith.mulf %93, %97 : vector<128x32xf32>
    %c1_65 = arith.constant 1 : index
    %c0_66 = arith.constant 0 : index
    %c0_67 = arith.constant 0 : index
    %99 = vector.load %arg11[%c1_65, %c0_66, %c0_67] : memref<2x1x32xf32, #tpu.memory_space<vmem>>, vector<1x1x32xf32>
    %100 = vector.shape_cast %99 : vector<1x1x32xf32> to vector<1x32xf32>
    %101 = vector.broadcast %100 : vector<1x32xf32> to vector<128x32xf32>
    %102 = arith.mulf %98, %101 : vector<128x32xf32>
    %c1_68 = arith.constant 1 : index
    %c0_69 = arith.constant 0 : index
    %c0_70 = arith.constant 0 : index
    %103 = vector.load %arg12[%c1_68, %c0_69, %c0_70] : memref<2x1x32xf32, #tpu.memory_space<vmem>>, vector<1x1x32xf32>
    %104 = vector.shape_cast %103 : vector<1x1x32xf32> to vector<1x32xf32>
    %105 = vector.broadcast %104 : vector<1x32xf32> to vector<128x32xf32>
    %106 = arith.addf %102, %105 : vector<128x32xf32>
    %107 = vector.shape_cast %106 : vector<128x32xf32> to vector<16x8x32xf32>
    %c0_71 = arith.constant 0 : index
    %c0_72 = arith.constant 0 : index
    %108 = vector.load %arg2[%c0_71, %c0_72] : memref<16x1xi32, #tpu.memory_space<vmem>>, vector<16x1xi32>
    %109 = tpu.iota {dimensions = array<i32: 1>} : vector<16x8xi32>
    %110 = vector.broadcast %108 : vector<16x1xi32> to vector<16x8xi32>
    %111 = arith.cmpi slt, %109, %110 : vector<16x8xi32>
    %112 = arith.extui %111 : vector<16x8xi1> to vector<16x8xi32>
    %113 = arith.sitofp %112 : vector<16x8xi32> to vector<16x8xf32>
    %114 = vector.shape_cast %113 : vector<16x8xf32> to vector<16x8x1xf32>
    %115 = vector.broadcast %114 : vector<16x8x1xf32> to vector<16x8x32xf32>
    %116 = arith.mulf %107, %115 : vector<16x8x32xf32>
    %cst_73 = arith.constant dense<0.000000e+00> : vector<16x32xf32>
    %117 = vector.multi_reduction <add>, %116, %cst_73 [1] : vector<16x8x32xf32> to vector<16x32xf32>
    %c1_i32 = arith.constant 1 : i32
    %118 = vector.broadcast %c1_i32 : i32 to vector<16x1xi32>
    %119 = arith.maxsi %108, %118 : vector<16x1xi32>
    %120 = arith.sitofp %119 : vector<16x1xi32> to vector<16x1xf32>
    %121 = tpu.reciprocal %120 {approx = true} : vector<16x1xf32> -> vector<16x1xf32>
    %122 = vector.broadcast %121 : vector<16x1xf32> to vector<16x32xf32>
    %123 = arith.mulf %117, %122 : vector<16x32xf32>
    %c0_i32 = arith.constant 0 : i32
    %124 = vector.broadcast %c0_i32 : i32 to vector<16x1xi32>
    %125 = arith.cmpi sgt, %108, %124 : vector<16x1xi32>
    %cst_74 = arith.constant 0.000000e+00 : f32
    %126 = vector.shape_cast %125 : vector<16x1xi1> to vector<16x1xi1>
    %127 = vector.broadcast %126 : vector<16x1xi1> to vector<16x32xi1>
    %128 = vector.broadcast %cst_74 : f32 to vector<16x32xf32>
    %129 = arith.select %127, %123, %128 : vector<16x32xi1>, vector<16x32xf32>
    %c0_75 = arith.constant 0 : index
    %c0_76 = arith.constant 0 : index
    %130 = vector.load %arg13[%c0_75, %c0_76] : memref<32x128xf32, #tpu.memory_space<vmem>>, vector<32x128xf32>
    %cst_77 = arith.constant dense<0.000000e+00> : vector<16x128xf32>
    %131 = tpu.matmul %129, %130, %cst_77 {dimension_numbers = #tpu.dot_dimension_numbers<[1], [0], [0], [1], [0, 0, 1, 1], [], []>} : vector<16x32xf32>, vector<32x128xf32>, vector<16x128xf32> -> vector<16x128xf32>
    %c0_78 = arith.constant 0 : index
    %c0_79 = arith.constant 0 : index
    %132 = vector.load %arg14[%c0_78, %c0_79] : memref<1x128xf32, #tpu.memory_space<vmem>>, vector<1x128xf32>
    %133 = vector.broadcast %132 : vector<1x128xf32> to vector<16x128xf32>
    %134 = arith.addf %131, %133 : vector<16x128xf32>
    %c0_80 = arith.constant 0 : index
    %c0_81 = arith.constant 0 : index
    %135 = vector.load %arg15[%c0_80, %c0_81] : memref<16x128xf32, #tpu.memory_space<vmem>>, vector<16x128xf32>
    tpu.vector_store %arg15[%c0_80, %c0_81], %134 {strides = array<i32>} : memref<16x128xf32, #tpu.memory_space<vmem>>, vector<16x128xf32>,
    return
  }
  func.func @transform_0(%arg0: i32) -> (i32, i32, i32) {
    %c0_i32 = arith.constant 0 : i32
    %c0_i32_0 = arith.constant 0 : i32
    %c0_i32_1 = arith.constant 0 : i32
    return %arg0, %c0_i32, %c0_i32_0 : i32, i32, i32
  }
  func.func @transform_1(%arg0: i32) -> (i32, i32) {
    %c0_i32 = arith.constant 0 : i32
    %c0_i32_0 = arith.constant 0 : i32
    return %arg0, %c0_i32 : i32, i32
  }
  func.func @transform_2(%arg0: i32) -> (i32, i32) {
    %c0_i32 = arith.constant 0 : i32
    %c0_i32_0 = arith.constant 0 : i32
    %c0_i32_1 = arith.constant 0 : i32
    return %c0_i32, %c0_i32_0 : i32, i32
  }
  func.func @transform_3(%arg0: i32) -> (i32, i32) {
    %c0_i32 = arith.constant 0 : i32
    %c0_i32_0 = arith.constant 0 : i32
    %c0_i32_1 = arith.constant 0 : i32
    return %c0_i32, %c0_i32_0 : i32, i32
  }
  func.func @transform_4(%arg0: i32) -> (i32, i32, i32) {
    %c0_i32 = arith.constant 0 : i32
    %c0_i32_0 = arith.constant 0 : i32
    %c0_i32_1 = arith.constant 0 : i32
    %c0_i32_2 = arith.constant 0 : i32
    return %c0_i32, %c0_i32_0, %c0_i32_1 : i32, i32, i32
  }
  func.func @transform_5(%arg0: i32) -> (i32, i32, i32) {
    %c0_i32 = arith.constant 0 : i32
    %c0_i32_0 = arith.constant 0 : i32
    %c0_i32_1 = arith.constant 0 : i32
    %c0_i32_2 = arith.constant 0 : i32
    return %c0_i32, %c0_i32_0, %c0_i32_1 : i32, i32, i32
  }
  func.func @transform_6(%arg0: i32) -> (i32, i32, i32) {
    %c0_i32 = arith.constant 0 : i32
    %c0_i32_0 = arith.constant 0 : i32
    %c0_i32_1 = arith.constant 0 : i32
    %c0_i32_2 = arith.constant 0 : i32
    return %c0_i32, %c0_i32_0, %c0_i32_1 : i32, i32, i32
  }
  func.func @transform_7(%arg0: i32) -> (i32, i32, i32) {
    %c0_i32 = arith.constant 0 : i32
    %c0_i32_0 = arith.constant 0 : i32
    %c0_i32_1 = arith.constant 0 : i32
    %c0_i32_2 = arith.constant 0 : i32
    return %c0_i32, %c0_i32_0, %c0_i32_1 : i32, i32, i32
  }
  func.func @transform_8(%arg0: i32) -> (i32, i32, i32) {
    %c0_i32 = arith.constant 0 : i32
    %c0_i32_0 = arith.constant 0 : i32
    %c0_i32_1 = arith.constant 0 : i32
    %c0_i32_2 = arith.constant 0 : i32
    return %c0_i32, %c0_i32_0, %c0_i32_1 : i32, i32, i32
  }
  func.func @transform_9(%arg0: i32) -> (i32, i32, i32) {
    %c0_i32 = arith.constant 0 : i32
    %c0_i32_0 = arith.constant 0 : i32
    %c0_i32_1 = arith.constant 0 : i32
    %c0_i32_2 = arith.constant 0 : i32
    return %c0_i32, %c0_i32_0, %c0_i32_1 : i32, i32, i32
  }
  func.func @transform_10(%arg0: i32) -> (i32, i32, i32) {
    %c0_i32 = arith.constant 0 : i32
    %c0_i32_0 = arith.constant 0 : i32
    %c0_i32_1 = arith.constant 0 : i32
    %c0_i32_2 = arith.constant 0 : i32
    return %c0_i32, %c0_i32_0, %c0_i32_1 : i32, i32, i32
  }
  func.func @transform_11(%arg0: i32) -> (i32, i32, i32) {
    %c0_i32 = arith.constant 0 : i32
    %c0_i32_0 = arith.constant 0 : i32
    %c0_i32_1 = arith.constant 0 : i32
    %c0_i32_2 = arith.constant 0 : i32
    return %c0_i32, %c0_i32_0, %c0_i32_1 : i32, i32, i32
  }
  func.func @transform_12(%arg0: i32) -> (i32, i32) {
    %c0_i32 = arith.constant 0 : i32
    %c0_i32_0 = arith.constant 0 : i32
    %c0_i32_1 = arith.constant 0 : i32
    return %c0_i32, %c0_i32_0 : i32, i32
  }
  func.func @transform_13(%arg0: i32) -> (i32, i32) {
    %c0_i32 = arith.constant 0 : i32
    %c0_i32_0 = arith.constant 0 : i32
    %c0_i32_1 = arith.constant 0 : i32
    return %c0_i32, %c0_i32_0 : i32, i32
  }
  func.func @transform_14(%arg0: i32) -> (i32, i32) {
    %c0_i32 = arith.constant 0 : i32
    %c0_i32_0 = arith.constant 0 : i32
    return %arg0, %c0_i32 : i32, i32
  }
}

</mosaic_0001>

<bundles_post_ra>
// kernel: tpu_custom_call.1
= control target key start
LH: loop header
LB: loop body
LE: loop exit
PB: predicated region body
PF: predicated region fallthrough
CT: control target
= control target key end

     0   :  { %s5705_s0 = inlined_call_operand.hbm [shape: f32[32,8,32], index: 0, kind: input, shape index: {}]   ;;  %s5706_s1 = inlined_call_operand.vmem [shape: s32[32,1], index: 1, kind: input, shape index: {}]   ;;  %s5707_s2 = inlined_call_operand.vmem [shape: f32[32,32], index: 2, kind: input, shape index: {}]   ;;  %s5708_s3 = inlined_call_operand.hbm [shape: f32[1,32], index: 3, kind: input, shape index: {}]   ;;  %s5709_s4 = inlined_call_operand.hbm [shape: f32[2,32,32], index: 4, kind: input, shape index: {}]   ;;  %s5710_s5 = inlined_call_operand.vmem [shape: f32[2,1,32], index: 5, kind: input, shape index: {}]   ;;  %s5711_s6 = inlined_call_operand.hbm [shape: f32[2,32,32], index: 6, kind: input, shape index: {}]   ;;  %s5712_s7 = inlined_call_operand.hbm [shape: f32[2,1,32], index: 7, kind: input, shape index: {}]   ;;  %s5713_s8 = inlined_call_operand.hbm [shape: f32[2,32,32], index: 8, kind: input, shape index: {}]   ;;  %s5714_s9 = inlined_call_operand.hbm [shape: f32[2,1,32], index: 9, kind: input, shape index: {}]   ;;  %s5715_s10 = inlined_call_operand.vmem [shape: f32[2,1,32], index: 10, kind: input, shape index: {}]   ;;  %s5716_s11 = inlined_call_operand.vmem [shape: f32[2,1,32], index: 11, kind: input, shape index: {}]   ;;  %s5717_s12 = inlined_call_operand.vmem [shape: f32[32,128], index: 12, kind: input, shape index: {}]   ;;  %s5718_s13 = inlined_call_operand.vmem [shape: f32[1,128], index: 13, kind: input, shape index: {}]   ;;  %s5719_s14 = inlined_call_operand.hbm [shape: f32[32,128], index: 14, kind: output, shape index: {}]  }
   0x1   :  { %5727 = sst [smem:[#allocation20_spill]] %s5706_s1 }
   0x2   :  { %5728 = sst [smem:[#allocation21_spill]] %s5708_s3 }
   0x3   :  { %5729 = sst [smem:[#allocation22_spill]] %s5711_s6 }
   0x4   :  { %5730 = sst [smem:[#allocation23_spill]] %s5716_s11 }
   0x5   :  { %5731 = sst [smem:[#allocation24_spill]] %s5717_s12 }
   0x6   :  { %5732 = sst [smem:[#allocation25_spill]] %s5718_s13 }
   0x7   :  { %5733 = sst [smem:[#allocation26_spill]] %s5719_s14 }
   0x8   :  { %19 = vsyncpa [#allocation3], 0 }
   0x9   :  { %21 = vsyncpa [#allocation3 + $0x1], 0 }
   0xa   :  { %22 = vsyncpa [#allocation6], 0 }
   0xb   :  { %23 = vsyncpa [#allocation9], 0 }
   0xc   :  { %24 = vsyncpa [#allocation12], 0 }
   0xd   :  { %25 = vsyncpa [#allocation4], 0 }
   0xe   :  { %27 = vsyncpa [#allocation4 + $0x1], 0  ;;  %s4420_s29 = smov 0   ;;  %s4422_s30 = smov 0  }
   0xf   :  { %s4424_s15 = smov 0   ;;  %s4426_s16 = smov 0  }
  0x10 LB: > { %s4329_s17 = smov [#allocation5]   ;;  %s4441_s19 = sadd.s32 4294967295, %s4327_s16   ;;  %s4327_s16 = sphi %s4426_s16, %s5764_s16   ;;  %s4323_s15 = sphi %s4424_s15, %s5763_s15   ;;  %s4319_s30 = sphi %s4422_s30, %s5762_s30   ;;  %s4315_s29 = sphi %s4420_s29, %s5761_s29  }
  0x11   : > { %s384_s18 = sshll.u32 %s4329_s17, 4  ;;  %p3257_p0 = scmp.ge.s32.totalorder %s4327_s16, 1  ;;  %s4446_s18 = int_to_ptr.vmem [resolvable:$true] %s384_s18 }
  0x12   : > { %p5723_p1 = scmp.eq.s32.totalorder %s4441_s19, 0  ;;  %p368_p2 = scmp.lt.s32.totalorder %s4327_s16, 3 }
  0x13   : > { %s4330_s21 = smov [#allocation8]   ;;  %s4331_s24 = smov [#allocation11]  }
  0x14   : > { %p4448_p3 = pnand %p3257_p0, %p368_p2  ;;  %s410_s22 = sshll.u32 %s4330_s21, 4  ;;  %s4461_s22 = int_to_ptr.vmem [resolvable:$true] %s410_s22 }
  0x15   : > { %s436_s25 = sshll.u32 %s4331_s24, 4  ;;  %s5736_s3 = sld [smem:[#allocation21_spill]]  ;;  %s4463_s25 = int_to_ptr.vmem [resolvable:$true] %s436_s25 }
  0x16   : > { %s5734_s20 = scalar_select %p4448_p3, 1, 0 }
  0x17   : > { %p3894_p5 = pneg %p4448_p3 }
  0x19   : > { %p4457_p6 = pnand %p3894_p5, %p5723_p1 }
  0x1b   : > { %s4051_s28 = scalar_lea.hbm %s5736_s3, 16  ;;  %p4473_p8 = pneg %p4457_p6 }
  0x1c   : > { %p4052_p7 = scmp.ne.s32.totalorder %s5736_s3, %s4051_s28  ;;  %p4058_p11 = scmp.lt.u32.totalorder %s4051_s28, %s5736_s3 }
  0x1e   : > { %p4054_p9 = pnand %p4473_p8, %p4052_p7 }
  0x20   : > { %p4055_p10 = pneg %p4054_p9 }
  0x22   : > { %p4060_p12 = pnand %p4058_p11, %p4055_p10 }
  0x24   : > { %4063 = shalt.err (!%p4060_p12)
}
  0x25   : > { %s4064_s14 = scalar_lea.vmem %s4446_s18, 16  ;;  %s4071_s26 = scalar_lea.vmem %s4446_s18, 32 }
  0x26   : > { %p4065_p13 = scmp.ne.s32.totalorder %s4446_s18, %s4064_s14  ;;  %p4072_p5 = scmp.lt.s32.totalorder %s4446_s18, %s4446_s18 }
  0x27   : > { %p4073_p7 = scmp.lt.s32.totalorder %s4071_s26, %s4064_s14 }
  0x28   : > { %p4067_p0 = pnand %p4065_p13, %p4473_p8 }
  0x29   : > { %p4074_p9 = por %p4073_p7, %p4072_p5 }
  0x2a   : > { %p4068_p2 = pneg %p4067_p0 }
  0x2c   : > { %p4075_p4 = pnand %p4074_p9, %p4068_p2 }
  0x2e   : > { %4078 = shalt.err (!%p4075_p4)
}
  0x2f   : > { %3897 = dma.hbm_to_vmem [thread:$0]  (!%p4457_p6), %s5736_s3, 16, %s4446_s18, [#allocation6]  }
  0x30   : > { %s5738_s6 = sld [smem:[#allocation22_spill]] }
  0x36   : > { %s4079_s24 = scalar_lea.hbm %s5738_s6, 1024 }
  0x37   : > { %p4080_p10 = scmp.ne.s32.totalorder %s5738_s6, %s4079_s24  ;;  %p4086_p4 = scmp.lt.u32.totalorder %s4079_s24, %s5738_s6 }
  0x39   : > { %p4082_p11 = pnand %p4080_p10, %p4473_p8 }
  0x3b   : > { %p4083_p12 = pneg %p4082_p11 }
  0x3d   : > { %p4088_p13 = pnand %p4086_p4, %p4083_p12 }
  0x3f   : > { %4091 = shalt.err (!%p4088_p13)
}
  0x40   : > { %s4092_s18 = scalar_lea.vmem %s4461_s22, 1024  ;;  %p4100_p7 = scmp.lt.s32.totalorder %s4461_s22, %s4461_s22 }
  0x41   : > { %p4093_p0 = scmp.ne.s32.totalorder %s4461_s22, %s4092_s18  ;;  %p4101_p9 = scmp.lt.s32.totalorder %s4092_s18, %s4092_s18 }
  0x43   : > { %p4095_p2 = pnand %p4093_p0, %p4473_p8  ;;  %p4102_p10 = por %p4101_p9, %p4100_p7 }
  0x45   : > { %p4096_p5 = pneg %p4095_p2 }
  0x47   : > { %p4103_p11 = pnand %p4102_p10, %p4096_p5 }
  0x49   : > { %4106 = shalt.err (!%p4103_p11)
}
  0x4a   : > { %s5725_s1 = smov 128   ;;  %s4333_s12 = smov 8  }
  0x4b   : > { %3903 = dma.hbm_to_vmem [thread:$0]  (!%p4457_p6), %s5738_s6, 1024, %s4461_s22, [#allocation9], %s5725_s1, %s5725_s1, %s4333_s12  }
  0x4c   : > { %s4107_s24 = scalar_lea.hbm %s5713_s8, 1024 }
  0x4d   : > { %p4108_p12 = scmp.ne.s32.totalorder %s5713_s8, %s4107_s24  ;;  %p4114_p0 = scmp.lt.u32.totalorder %s4107_s24, %s5713_s8 }
  0x4f   : > { %p4110_p4 = pnand %p4108_p12, %p4473_p8 }
  0x51   : > { %p4111_p13 = pneg %p4110_p4 }
  0x53   : > { %p4116_p2 = pnand %p4114_p0, %p4111_p13 }
  0x55   : > { %4119 = shalt.err (!%p4116_p2)
}
  0x56   : > { %s4120_s22 = scalar_lea.vmem %s4463_s25, 1024  ;;  %p4128_p10 = scmp.lt.s32.totalorder %s4463_s25, %s4463_s25 }
  0x57   : > { %p4121_p5 = scmp.ne.s32.totalorder %s4463_s25, %s4120_s22  ;;  %p4129_p11 = scmp.lt.s32.totalorder %s4120_s22, %s4120_s22 }
  0x59   : > { %p4123_p7 = pnand %p4121_p5, %p4473_p8  ;;  %p4130_p12 = por %p4129_p11, %p4128_p10 }
  0x5b   : > { %p4124_p9 = pneg %p4123_p7 }
  0x5d   : > { %p4131_p4 = pnand %p4130_p12, %p4124_p9 }
  0x5f   : > { %4134 = shalt.err (!%p4131_p4)
}
  0x60   : > { %3909 = dma.hbm_to_vmem [thread:$0]  (!%p4457_p6), %s5713_s8, 1024, %s4463_s25, [#allocation12], %s5725_s1, %s5725_s1, %s4333_s12  }
  0x61   : > { %s4334_s27 = smov [#allocation7]   ;;  %s4335_s17 = smov [#allocation10]  }
  0x62   : > { %s394_s28 = sshll.u32 %s4334_s27, 4  ;;  %s423_s24 = sshll.u32 %s4335_s17, 4  ;;  %s395_s28 = int_to_ptr.vmem [resolvable:$true] %s394_s28  ;;  %s424_s24 = int_to_ptr.vmem [resolvable:$true] %s423_s24 }
  0x63   : > { %s4135_s18 = scalar_lea.hbm %s5709_s4, 1024 }
  0x64   : > { %p4136_p13 = scmp.ne.s32.totalorder %s5709_s4, %s4135_s18  ;;  %p4142_p5 = scmp.lt.u32.totalorder %s4135_s18, %s5709_s4 }
  0x66   : > { %p4138_p0 = pnand %p4136_p13, %p4473_p8 }
  0x68   : > { %p4139_p2 = pneg %p4138_p0 }
  0x6a   : > { %p4144_p7 = pnand %p4142_p5, %p4139_p2 }
  0x6c   : > { %4147 = shalt.err (!%p4144_p7)
}
  0x6d   : > { %s4148_s25 = scalar_lea.vmem %s395_s28, 1024  ;;  %p4156_p12 = scmp.lt.s32.totalorder %s395_s28, %s395_s28 }
  0x6e   : > { %p4149_p9 = scmp.ne.s32.totalorder %s395_s28, %s4148_s25  ;;  %p4157_p4 = scmp.lt.s32.totalorder %s4148_s25, %s4148_s25 }
  0x70   : > { %p4151_p10 = pnand %p4149_p9, %p4473_p8  ;;  %p4158_p1 = por %p4157_p4, %p4156_p12 }
  0x72   : > { %p4152_p11 = pneg %p4151_p10 }
  0x74   : > { %p4159_p3 = pnand %p4158_p1, %p4152_p11 }
  0x76   : > { %4162 = shalt.err (!%p4159_p3)
}
  0x77   : > { %3900 = dma.hbm_to_vmem [thread:$0]  (!%p4457_p6), %s5709_s4, 1024, %s395_s28, [#allocation6], %s5725_s1, %s5725_s1, %s4333_s12  }
  0x78   : > { %s4163_s17 = scalar_lea.hbm %s5712_s7, 32 }
  0x79   : > { %p4164_p1 = scmp.ne.s32.totalorder %s5712_s7, %s4163_s17  ;;  %p4170_p0 = scmp.lt.u32.totalorder %s4163_s17, %s5712_s7 }
  0x7b   : > { %p4166_p3 = pnand %p4164_p1, %p4473_p8 }
  0x7d   : > { %p4167_p13 = pneg %p4166_p3 }
  0x7f   : > { %p4172_p2 = pnand %p4170_p0, %p4167_p13 }
  0x81   : > { %4175 = shalt.err (!%p4172_p2)
}
  0x82   : > { %s4176_s3 = scalar_lea.vmem %s424_s24, 32  ;;  %p4184_p10 = scmp.lt.s32.totalorder %s424_s24, %s424_s24 }
  0x83   : > { %p4177_p5 = scmp.ne.s32.totalorder %s424_s24, %s4176_s3  ;;  %p4185_p11 = scmp.lt.s32.totalorder %s4176_s3, %s4176_s3 }
  0x85   : > { %p4179_p7 = pnand %p4177_p5, %p4473_p8  ;;  %p4186_p12 = por %p4185_p11, %p4184_p10 }
  0x87   : > { %p4180_p9 = pneg %p4179_p7 }
  0x89   : > { %p4187_p4 = pnand %p4186_p12, %p4180_p9 }
  0x8b   : > { %4190 = shalt.err (!%p4187_p4)
}
  0x8c   : > { %s4336_s28 = smov 16   ;;  %s4337_s25 = smov 1  }
  0x8d   : > { %3906 = dma.hbm_to_vmem [thread:$0]  (!%p4457_p6), %s5712_s7, 32, %s424_s24, [#allocation9], %s4336_s28, %s4336_s28, %s4337_s25  }
  0x8e   : > { %s4338_s13 = smov [#allocation13]   ;;  %s4191_s26 = scalar_lea.hbm %s5714_s9, 32 }
  0x8f   : > { %s449_s27 = sshll.u32 %s4338_s13, 4  ;;  %p4192_p1 = scmp.ne.s32.totalorder %s5714_s9, %s4191_s26  ;;  %s450_s27 = int_to_ptr.vmem [resolvable:$true] %s449_s27 }
  0x90   : > { %p4198_p0 = scmp.lt.u32.totalorder %s4191_s26, %s5714_s9 }
  0x91   : > { %p4194_p3 = pnand %p4192_p1, %p4473_p8 }
  0x93   : > { %p4195_p13 = pneg %p4194_p3 }
  0x95   : > { %p4200_p2 = pnand %p4198_p0, %p4195_p13 }
  0x97   : > { %4203 = shalt.err (!%p4200_p2)
}
  0x98   : > { %s4204_s24 = scalar_lea.vmem %s450_s27, 32  ;;  %p4212_p10 = scmp.lt.s32.totalorder %s450_s27, %s450_s27 }
  0x99   : > { %p4205_p5 = scmp.ne.s32.totalorder %s450_s27, %s4204_s24  ;;  %p4213_p11 = scmp.lt.s32.totalorder %s4204_s24, %s4204_s24 }
  0x9b   : > { %p4207_p7 = pnand %p4205_p5, %p4473_p8  ;;  %p4214_p12 = por %p4213_p11, %p4212_p10 }
  0x9d   : > { %p4208_p9 = pneg %p4207_p7 }
  0x9f   : > { %p4215_p4 = pnand %p4214_p12, %p4208_p9 }
  0xa1   : > { %4218 = shalt.err (!%p4215_p4)
}
  0xa2   : > { %3912 = dma.hbm_to_vmem [thread:$0]  (!%p4457_p6), %s5714_s9, 32, %s450_s27, [#allocation12], %s4336_s28, %s4336_s28, %s4337_s25  }
  0xa3   : > { %s3256_s21 = sadd.s32 4294967294, %s4327_s16   ;;  %s4606_s23 = sadd.s32 1, %s4327_s16  }
  0xa4   : > { %s37_s1 = ssub.s32 %s4327_s16, %s4606_s23  ;;  %s40_s13 = sadd.s32 1, %s4323_s15 }
  0xa5   : > { %p38_p8 = scmp.eq.s32.totalorder %s37_s1, 0  ;;  %p47_p1 = scmp.ne.s32.totalorder %s4323_s15, %s4319_s30 }
  0xa6   : > { %p48_p3 = scmp.eq.s32.totalorder %s4327_s16, 0  ;;  %p53_p13 = scmp.ne.s32.totalorder %s4319_s30, %s4315_s29 }
  0xa7   : > { %s4617_s17 = scalar_select %p38_p8, %s4323_s15, %s40_s13  }
  0xa8   : > { %p4619_p0 = por %p48_p3, %p47_p1  ;;  %p5740_p2 = scmp.eq.s32.totalorder %s4441_s19, 0 }
  0xa9   : > { %p355_p5 = scmp.eq.s32.totalorder %s4441_s19, 1  ;;  %p361_p7 = scmp.eq.s32.totalorder %s3256_s21, 1 }
  0xaa   : > { %p4625_p6 = por %p5740_p2, %p53_p13  ;;  %p3927_p9 = scmp.lt.s32.totalorder %s4327_s16, 2 }
  0xab   : > { %s475_s25 = sand.u32 1, %s4323_s15   ;;  %p4632_p10 = por %p355_p5, %p47_p1 }
  0xac   : > { %p4636_p11 = por %p361_p7, %p53_p13  ;;  %s3265_s18 = sshll.u32 %s475_s25, 7 }
  0xad   : > { %s5742_s27 = scalar_select %p4632_p10, 1, 0 }
  0xae   : > { %s5743_s26 = scalar_select %p4636_p11, 1, 0 }
  0xaf   : > { %s3415_s22 = sshll.u32 %s4327_s16, 11  ;;  %s479_s11 = scalar_lea.vmem [#allocation2], %s3265_s18 }
  0xb0   : > { %s4644_s6 = scalar_lea.hbm %s5705_s0, %s3415_s22  ;;  %s486_s21 = sshll.u32 %s479_s11, 4  ;;  %s4646_s21 = int_to_ptr.vmem [resolvable:$true] %s486_s21 }
  0xb1   : > { %p4650_p12 = pnand %p3927_p9, %p4619_p0  ;;  %s4654_s13 = scalar_lea.sflag [#allocation3], %s475_s25 }
  0xb2   : > { %s4219_s3 = scalar_lea.hbm %s4644_s6, 2048  ;;  %s4224_s14 = scalar_lea.hbm %s5705_s0, 4096 }
  0xb3   : > { %p4220_p4 = scmp.ne.s32.totalorder %s4644_s6, %s4219_s3  ;;  %p4221_p8 = pneg %p4650_p12 }
  0xb4   : > { %p4225_p13 = scmp.lt.u32.totalorder %s4644_s6, %s5705_s0  ;;  %p4226_p0 = scmp.lt.u32.totalorder %s4224_s14, %s4219_s3 }
  0xb5   : > { %p4222_p1 = pnand %p4221_p8, %p4220_p4  ;;  %p4228_p5 = scmp.lt.u32.totalorder %s4219_s3, %s4644_s6 }
  0xb6   : > { %p4227_p2 = por %p4226_p0, %p4225_p13 }
  0xb7   : > { %p4223_p3 = pneg %p4222_p1 }
  0xb8   : > { %p4229_p7 = por %p4228_p5, %p4227_p2 }
  0xba   : > { %p4230_p9 = pnand %p4229_p7, %p4223_p3 }
  0xbc   : > { %4233 = shalt.err (!%p4230_p9)
}
  0xbd   : > { %s4234_s25 = scalar_lea.vmem %s4646_s21, 2048  ;;  %s4339_s18 = smov [#allocation2]  }
  0xbe   : > { %p4235_p4 = scmp.ne.s32.totalorder %s4646_s21, %s4234_s25  ;;  %s4239_s22 = sshll.u32 %s4339_s18, 4  ;;  %s4240_s22 = int_to_ptr.vmem [resolvable:$false] %s4239_s22 }
  0xbf   : > { %s4241_s24 = scalar_lea.vmem %s4240_s22, 4096  ;;  %p4242_p10 = scmp.lt.s32.totalorder %s4646_s21, %s4240_s22 }
  0xc0   : > { %p4237_p1 = pnand %p4235_p4, %p4221_p8  ;;  %p4243_p13 = scmp.lt.s32.totalorder %s4241_s24, %s4234_s25 }
  0xc2   : > { %p4238_p11 = pneg %p4237_p1  ;;  %p4244_p0 = por %p4243_p13, %p4242_p10 }
  0xc4   : > { %p4245_p2 = pnand %p4244_p0, %p4238_p11 }
  0xc6   : > { %4248 = shalt.err (!%p4245_p2)
}
  0xc7   : > { %s5745_s3 = smov 128   ;;  %p5746_p8 = scmp.ne.s32.totalorder %s5734_s20, 0 }
  0xc8   : > { %3916 = dma.hbm_to_vmem [thread:$0]  (!%p4650_p12), %s4644_s6, 2048, %s4646_s21, %s4654_s13, %s5745_s3, %s5745_s3, %s4333_s12  }
  0xc9   : > { %507 = sbr.rel (%p5746_p8) target bundleno = 2681 (0xa79), region = 76  ;;  %s4688_s14 = sand.u32 (!%p5746_p8), 1, %s4319_s30  }
  0xca   : > { %s3269_s11 = sshll.u32 (!%p5746_p8), %s4688_s14, 7  ;;  %s510_s25 = scalar_lea.sflag (!%p5746_p8), [#allocation3], %s4688_s14 }
  0xcb   : > { %s4692_s18 = scalar_lea.vmem (!%p5746_p8), [#allocation2], %s3269_s11 }
  0xd0   : > { %4294 = dma.done.wait (%p4625_p6), %s510_s25, 2048  }
  0xd1   : > { %4296 = vsyncadd (%p4625_p6), %s510_s25, 4294965248  ;;  %p5747_p10 = scmp.eq.s32.totalorder %s4441_s19, 0 }
  0xd3   : > { %4298 = dma.done.wait (%p5747_p10), [#allocation6], 1040   ;;  %p5748_p11 = pmov %p5747_p10 }
  0xd4   : > { %p5749_p12 = pmov %p5747_p10 }
  0xd5   : > { %4300 = vsyncadd (%p5748_p11), [#allocation6], 4294966256 }
  0xd6   : > { %4302 = dma.done.wait (%p5749_p12), [#allocation9], 1056   ;;  %p5750_p3 = pmov %p5747_p10 }
  0xd8   : > { %4304 = vsyncadd (%p5750_p3), [#allocation9], 4294966240  ;;  %p5751_p5 = pmov %p5750_p3 }
  0xd9   : > { %p5752_p7 = pmov %p5750_p3 }
  0xda   : > { %4306 = dma.done.wait (%p5751_p5), [#allocation12], 1056  }
  0xdb   : > { %4308 = vsyncadd (%p5752_p7), [#allocation12], 4294966240  ;;  %vm622_vm0 = vcmask 261120   ;;  %v611_v0 = vld [vmem:[%s5707_s2] sm:$0xff]  ;;  %v612_v1 = vld [vmem:[%s5707_s2 + $0x8] sm:$0xff]  ;;  %s5753_s12 = sld [smem:[#allocation23_spill]] }
  0xdc   : > { %v613_v2 = vld [vmem:[%s5707_s2 + $0x10] sm:$0xff]  ;;  %v3798_v3 = vpack.c.bf16 %v612_v1, %v611_v0  ;;  %v614_v4 = vld [vmem:[%s5707_s2 + $0x18] sm:$0xff]  ;;  %v595_v5 = vld [vmem:[%s4692_s18] sm:$0xff]  ;;  %s3277_s21 = sshll.u32 %s4441_s19, 1  ;;  %s5754_s24 = sld [smem:[#allocation20_spill]]  ;;  %vm2968_vm7 = vcmask 1041409  }
  0xdd   : > { %v3802_v6 = vpack.c.bf16 %v614_v4, %v613_v2  ;;  %3571 = vmatprep.mubr.msk.f32.mxu0 %vm622_vm0, %v595_v5  ;;  %v605_v7 = vld [vmem:[%s4692_s18 + $0x50] sm:$0xff]  ;;  %v816_v8 = vld [vmem:[#allocation7] sm:$0xff]  ;;  %v819_v11 = vld [vmem:[#allocation7 + $0x18] sm:$0xff]  ;;  %p589_p6 = scmp.lt.s32.totalorder %s3277_s21, 3  ;;  %vm2971_vm8 = vcmask 1042434   ;;  %vm2974_vm9 = vcmask 1043459  }
  0xde   : > { %3799 = vmatprep.subr.bf16.mxu0 %v3798_v3  ;;  %3862 = vmatprep.subr.bf16.mxu1 %v3798_v3  ;;  %v817_v9 = vld [vmem:[#allocation7 + $0x8] sm:$0xff]  ;;  %v818_v10 = vld [vmem:[#allocation7 + $0x10] sm:$0xff]  ;;  %v607_v16 = vld [vmem:[%s4692_s18 + $0x60] sm:$0xff]  ;;  %vm2977_vm10 = vcmask 1044484   ;;  %vm2980_vm11 = vcmask 1045509   ;;  %vm2983_vm12 = vcmask 1046534  }
  0xdf   : > { %3801 = vmatpush3.bf16.msra.mxu0 %v3798_v3  ;;  %3864 = vmatpush3.bf16.msra.mxu1 %v3798_v3  ;;  %v596_v12 = vld [vmem:[%s4692_s18 + $0x8] sm:$0xff]  ;;  %v606_v13 = vld [vmem:[%s4692_s18 + $0x58] sm:$0xff]  ;;  %v3806_v14 = vpack.c.bf16 %v817_v9, %v816_v8  ;;  %v597_v15 = vld [vmem:[%s4692_s18 + $0x10] sm:$0xff]  ;;  %v3810_v17 = vpack.c.bf16 %v819_v11, %v818_v10  ;;  %s5766_s21 = smov (!%p589_p6, %s3277_s21), 3  ;;  %vm2986_vm13 = vcmask 1047559   ;;  %s3276_s25 = sshll.u32 %s4688_s14, 4 }
  0xe0   : > { %3803 = vmatprep.subr.bf16.mxu0 %v3802_v6  ;;  %3863 = vmatprep.subr.bf16.mxu1 %v3802_v6  ;;  %v598_v18 = vld [vmem:[%s4692_s18 + $0x18] sm:$0xff]  ;;  %v608_v19 = vld [vmem:[%s4692_s18 + $0x68] sm:$0xff]  ;;  %v599_v20 = vld [vmem:[%s4692_s18 + $0x20] sm:$0xff]  ;;  %s3278_s1 = sshll.u32 %s5766_s21, 3  ;;  %s586_s20 = scalar_lea.vmem [#allocation14], %s3276_s25 }
  0xe1   : > { %3586 = vmatprep.mubr.msk.f32.mxu1 %vm622_vm0, %v605_v7  ;;  %v609_v21 = vld [vmem:[%s4692_s18 + $0x70] sm:$0xff]  ;;  %v600_v22 = vld [vmem:[%s4692_s18 + $0x28] sm:$0xff]  ;;  %v610_v23 = vld [vmem:[%s4692_s18 + $0x78] sm:$0xff]  ;;  %s3114_s28 = sshll.u32 %s586_s20, 4  ;;  %s3416_s13 = sshll.u32 %s4441_s19, 8  ;;  %s5656_s28 = int_to_ptr.vmem [resolvable:$true] %s3114_s28 }
  0xe2   : > { %v601_v24 = vld [vmem:[%s4692_s18 + $0x30] sm:$0xff]  ;;  %v602_v25 = vld [vmem:[%s4692_s18 + $0x38] sm:$0xff]  ;;  %v603_v26 = vld [vmem:[%s4692_s18 + $0x40] sm:$0xff]  ;;  %s592_s3 = scalar_lea.vmem %s5754_s24, %s3278_s1  ;;  %s5756_s1 = sld [smem:[#allocation25_spill]] }
  0xe3   : > { %3805 = vmatpush3.bf16.msra.mxu0 %v3802_v6  ;;  %3865 = vmatpush3.bf16.msra.mxu1 %v3802_v6  ;;  %v604_v27 = vld [vmem:[%s4692_s18 + $0x48] sm:$0xff]  ;;  %v1022_v30 = vld [vmem:[#allocation8 + $0x10] sm:$0xff]  ;;  %v1023_v32 = vld [vmem:[#allocation8 + $0x18] sm:$0xff]  ;;  %s5755_s18 = sld [smem:[#allocation24_spill]]  ;;  %s3101_s25 = scalar_lea.sflag [#allocation4], %s4688_s14 }
  0xe4   : > { %3807 = vmatprep.subr.bf16.mxu1 %v3806_v14  ;;  %v1020_v28 = vld [vmem:[#allocation8] sm:$0xff]  ;;  %v1021_v29 = vld [vmem:[#allocation8 + $0x8] sm:$0xff]  ;;  %v3818_v33 = vpack.c.bf16 %v1023_v32, %v1022_v30  ;;  %v3279_v34 = vld [vmem:[#allocation5] ss:$0 sm:$0xff]  ;;  %s4249_s6 = scalar_lea.vmem %s5656_s28, 256  ;;  %p5758_p4 = scmp.ne.s32.totalorder %s5742_s27, 0 }
  0xe5   : > { %v3814_v31 = vpack.c.bf16 %v1021_v29, %v1020_v28  ;;  %v1240_v3 = vld [vmem:[#allocation11] sm:$0xff]  ;;  %v1241_v4 = vld [vmem:[#allocation11 + $0x8] sm:$0xff]  ;;  %v1242_v5 = vld [vmem:[#allocation11 + $0x10] sm:$0xff]  ;;  %p4250_p9 = scmp.ne.s32.totalorder %s5656_s28, %s4249_s6  ;;  %s4342_s19 = smov [#allocation14]  }
  0xe6   : > { %3572 = vmatmul.mubr.msk.f32.vlgmr.msra.gmra.mrb[0].mxu0 %vm622_vm0, %v596_v12  ;;  %3587 = vmatmul.mubr.msk.f32.vlgmr.msra.gmra.mrb[0].mxu1 %vm622_vm0, %v606_v13  ;;  %v3822_v6 = vpack.c.bf16 %v1241_v4, %v1240_v3  ;;  %v1243_v7 = vld [vmem:[#allocation11 + $0x18] sm:$0xff]  ;;  %s4253_s21 = sshll.u32 %s4342_s19, 4  ;;  %s4254_s21 = int_to_ptr.vmem [resolvable:$false] %s4253_s21 }
  0xe7   : > { %3574 = vmatprep.mubr.msk.f32.mxu0 %vm622_vm0, %v597_v15  ;;  %3589 = vmatprep.mubr.msk.f32.mxu1 %vm622_vm0, %v607_v16  ;;  %v3826_v8 = vpack.c.bf16 %v1243_v7, %v1242_v5  ;;  %v3296_v9 = vld [vmem:[%s5710_s5] ss:$0 sm:$0xff]  ;;  %p4251_p1 = pnand %p4250_p9, %p5758_p4  ;;  %p4256_p0 = scmp.lt.s32.totalorder %s5656_s28, %s4254_s21 }
  0xe8   : > { %3809 = vmatpush3.bf16.msra.mxu1 %v3806_v14  ;;  %3815 = vmatprep.subr.bf16.mxu0 %v3814_v31 }
  0xe9   : > { %3811 = vmatprep.subr.bf16.mxu1 %v3810_v17  ;;  %3817 = vmatpush3.bf16.msra.mxu0 %v3814_v31  ;;  %p4252_p13 = pneg %p4251_p1 }
  0xea   : > { %3575 = vmatmul.mubr.msk.f32.gmra.mrb[2].mxu0 %vm622_vm0, %v598_v18  ;;  %3590 = vmatmul.mubr.msk.f32.gmra.mrb[2].mxu1 %vm622_vm0, %v608_v19 }
  0xeb   : > { %3577 = vmatprep.mubr.msk.f32.mxu0 %vm622_vm0, %v599_v20  ;;  %3592 = vmatprep.mubr.msk.f32.mxu1 %vm622_vm0, %v609_v21 }
  0xec   : > { %3813 = vmatpush3.bf16.msra.mxu1 %v3810_v17  ;;  %3819 = vmatprep.subr.bf16.mxu0 %v3818_v33 }
  0xed   : > { %3821 = vmatpush3.bf16.msra.mxu0 %v3818_v33  ;;  %3823 = vmatprep.subr.bf16.mxu1 %v3822_v6 }
  0xee   : > { %3578 = vmatmul.mubr.msk.f32.gmra.mrb[4].mxu0 %vm622_vm0, %v600_v22  ;;  %3593 = vmatmul.mubr.msk.f32.gmra.mrb[4].mxu1 %vm622_vm0, %v610_v23 }
  0xef   : > { %3580 = vmatprep.mubr.msk.f32.mxu0 %vm622_vm0, %v601_v24 }
  0xf2   : > { %3581 = vmatmul.mubr.msk.f32.gmra.mrb[6].mxu0 %vm622_vm0, %v602_v25 }
  0xf3   : > { %3583 = vmatprep.mubr.msk.f32.mxu0 %vm622_vm0, %v603_v26 }
  0xf6   : > { %3584 = vmatmul.mubr.msk.f32.gmra.mrb[8].mxu0 %vm622_vm0, %v604_v27 }
 0x1b9   : > { %v3573_v35 = vpop.f32.mrb[0].mxu0  ;;  %v3588_v36 = vpop.f32.mrb[0].mxu1 }
 0x1ba   : > { %v737_v37 = vpop.f32.mrb[1].mxu0  ;;  %v787_v38 = vpop.f32.mrb[1].mxu1  ;;  %v4756_v40 = vadd.f32 %v3573_v35, %v3279_v34  ;;  %v4794_v62 = vadd.f32 %v3588_v36, %v3279_v34 }
 0x1bb   : > { %v4754_v39 = vadd.f32 %v3279_v34, %v737_v37  ;;  %v4790_v61 = vadd.f32 %v3279_v34, %v787_v38 }
 0x1bd   : > { %v3576_v41 = vpop.f32.mrb[2].mxu0  ;;  %3603 = vmatprep.mubr.msk.f32.mxu1 %vm622_vm0, %v4754_v39  ;;  %v3591_v42 = vpop.f32.mrb[2].mxu1 }
 0x1be   : > { %v4760_v43 = vadd.f32 %v3576_v41, %v3279_v34  ;;  %v747_v44 = vpop.f32.mrb[3].mxu0  ;;  %3604 = vmatmul.mubr.msk.f32.vlgmr.msra.gmra.mrb[6].mxu1 %vm622_vm0, %v4756_v40  ;;  %v797_v45 = vpop.f32.mrb[3].mxu1  ;;  %v4802_v0 = vadd.f32 %v3591_v42, %v3279_v34 }
 0x1bf   : > { %v4764_v46 = vadd.f32 %v3279_v34, %v747_v44  ;;  %v4800_v63 = vadd.f32 %v3279_v34, %v797_v45  ;;  %3825 = vmatpush3.bf16.msra.mxu1 %v3822_v6  ;;  %v3313_v45 = vld [vmem:[#allocation10] ss:$0 sm:$0xff] }
 0x1c0   : > { %3827 = vmatprep.subr.bf16.mxu1 %v3826_v8 }
 0x1c1   : > { %v3579_v47 = vpop.f32.mrb[4].mxu0  ;;  %3606 = vmatprep.mubr.msk.f32.mxu1 %vm622_vm0, %v4764_v46  ;;  %v3594_v48 = vpop.f32.mrb[4].mxu1 }
 0x1c2   : > { %v4768_v49 = vadd.f32 %v3579_v47, %v3279_v34  ;;  %v757_v50 = vpop.f32.mrb[5].mxu0  ;;  %3607 = vmatmul.mubr.msk.f32.gmra.mrb[8].mxu1 %vm622_vm0, %v4760_v43  ;;  %v807_v51 = vpop.f32.mrb[5].mxu1  ;;  %v4810_v2 = vadd.f32 %v3594_v48, %v3279_v34 }
 0x1c3   : > { %v4772_v52 = vadd.f32 %v3279_v34, %v757_v50  ;;  %v4808_v1 = vadd.f32 %v3279_v34, %v807_v51  ;;  %3829 = vmatpush3.bf16.msra.mxu1 %v3826_v8 }
 0x1c5   : > { %v3582_v53 = vpop.f32.mrb[6].mxu0  ;;  %3609 = vmatprep.mubr.msk.f32.mxu1 %vm622_vm0, %v4772_v52 }
 0x1c6   : > { %v4776_v54 = vadd.f32 %v3582_v53, %v3279_v34  ;;  %v767_v55 = vpop.f32.mrb[7].mxu0  ;;  %3610 = vmatmul.mubr.msk.f32.gmra.mrb[10].mxu1 %vm622_vm0, %v4768_v49 }
 0x1c7   : > { %v4780_v56 = vadd.f32 %v3279_v34, %v767_v55 }
 0x1c9   : > { %v3585_v57 = vpop.f32.mrb[8].mxu0  ;;  %3612 = vmatprep.mubr.msk.f32.mxu1 %vm622_vm0, %v4780_v56 }
 0x1ca   : > { %v4784_v58 = vadd.f32 %v3585_v57, %v3279_v34  ;;  %v777_v59 = vpop.f32.mrb[9].mxu0  ;;  %3613 = vmatmul.mubr.msk.f32.gmra.mrb[12].mxu1 %vm622_vm0, %v4776_v54 }
 0x1cb   : > { %v4788_v60 = vadd.f32 %v3279_v34, %v777_v59 }
 0x1cd   : > { %3615 = vmatprep.mubr.msk.f32.mxu1 %vm622_vm0, %v4788_v60 }
 0x1ce   : > { %3616 = vmatmul.mubr.msk.f32.gmra.mrb[14].mxu1 %vm622_vm0, %v4784_v58 }
 0x1cf   : > { %3618 = vmatprep.mubr.msk.f32.mxu1 %vm622_vm0, %v4790_v61 }
 0x1d2   : > { %3619 = vmatmul.mubr.msk.f32.gmra.mrb[16].mxu1 %vm622_vm0, %v4794_v62 }
 0x1d3   : > { %3621 = vmatprep.mubr.msk.f32.mxu1 %vm622_vm0, %v4800_v63 }
 0x1d6   : > { %3622 = vmatmul.mubr.msk.f32.gmra.mrb[18].mxu1 %vm622_vm0, %v4802_v0 }
 0x1d7   : > { %3624 = vmatprep.mubr.msk.f32.mxu1 %vm622_vm0, %v4808_v1 }
 0x1da   : > { %3625 = vmatmul.mubr.msk.f32.gmra.mrb[20].mxu1 %vm622_vm0, %v4810_v2 }
 0x291   : > { %v3605_v10 = vpop.f32.mrb[6].mxu1 }
 0x292   : > { %v941_v11 = vpop.f32.mrb[7].mxu1  ;;  %v947_v13 = vadd.f32 %v3605_v10, %v3296_v9 }
 0x293   : > { %v942_v12 = vadd.f32 %v3296_v9, %v941_v11 }
 0x295   : > { %v3608_v14 = vpop.f32.mrb[8].mxu1  ;;  %3635 = vmatprep.mubr.msk.f32.mxu0 %vm622_vm0, %v942_v12 }
 0x296   : > { %v957_v15 = vadd.f32 %v3608_v14, %v3296_v9  ;;  %v951_v16 = vpop.f32.mrb[9].mxu1  ;;  %3636 = vmatmul.mubr.msk.f32.vlgmr.msra.gmra.mrb[10].mxu0 %vm622_vm0, %v947_v13 }
 0x297   : > { %v952_v17 = vadd.f32 %v3296_v9, %v951_v16 }
 0x299   : > { %v3611_v18 = vpop.f32.mrb[10].mxu1  ;;  %3638 = vmatprep.mubr.msk.f32.mxu0 %vm622_vm0, %v952_v17 }
 0x29a   : > { %v967_v19 = vadd.f32 %v3611_v18, %v3296_v9  ;;  %v961_v20 = vpop.f32.mrb[11].mxu1  ;;  %3639 = vmatmul.mubr.msk.f32.gmra.mrb[12].mxu0 %vm622_vm0, %v957_v15 }
 0x29b   : > { %v962_v21 = vadd.f32 %v3296_v9, %v961_v20 }
 0x29d   : > { %v3614_v22 = vpop.f32.mrb[12].mxu1  ;;  %3641 = vmatprep.mubr.msk.f32.mxu0 %vm622_vm0, %v962_v21 }
 0x29e   : > { %v977_v23 = vadd.f32 %v3614_v22, %v3296_v9  ;;  %v971_v24 = vpop.f32.mrb[13].mxu1  ;;  %3642 = vmatmul.mubr.msk.f32.gmra.mrb[14].mxu0 %vm622_vm0, %v967_v19 }
 0x29f   : > { %v972_v25 = vadd.f32 %v3296_v9, %v971_v24 }
 0x2a1   : > { %v3617_v26 = vpop.f32.mrb[14].mxu1  ;;  %3644 = vmatprep.mubr.msk.f32.mxu0 %vm622_vm0, %v972_v25 }
 0x2a2   : > { %v987_v27 = vadd.f32 %v3617_v26, %v3296_v9  ;;  %v981_v28 = vpop.f32.mrb[15].mxu1  ;;  %3645 = vmatmul.mubr.msk.f32.gmra.mrb[16].mxu0 %vm622_vm0, %v977_v23 }
 0x2a3   : > { %v982_v29 = vadd.f32 %v3296_v9, %v981_v28 }
 0x2a5   : > { %v3620_v30 = vpop.f32.mrb[16].mxu1  ;;  %3647 = vmatprep.mubr.msk.f32.mxu0 %vm622_vm0, %v982_v29 }
 0x2a6   : > { %v997_v31 = vadd.f32 %v3620_v30, %v3296_v9  ;;  %v991_v32 = vpop.f32.mrb[17].mxu1  ;;  %3648 = vmatmul.mubr.msk.f32.gmra.mrb[18].mxu0 %vm622_vm0, %v987_v27 }
 0x2a7   : > { %v992_v33 = vadd.f32 %v3296_v9, %v991_v32 }
 0x2a9   : > { %v3623_v34 = vpop.f32.mrb[18].mxu1  ;;  %3650 = vmatprep.mubr.msk.f32.mxu0 %vm622_vm0, %v992_v33 }
 0x2aa   : > { %v1007_v35 = vadd.f32 %v3623_v34, %v3296_v9  ;;  %v1001_v36 = vpop.f32.mrb[19].mxu1  ;;  %3651 = vmatmul.mubr.msk.f32.gmra.mrb[20].mxu0 %vm622_vm0, %v997_v31 }
 0x2ab   : > { %v1002_v37 = vadd.f32 %v3296_v9, %v1001_v36 }
 0x2ad   : > { %v3626_v38 = vpop.f32.mrb[20].mxu1  ;;  %3653 = vmatprep.mubr.msk.f32.mxu0 %vm622_vm0, %v1002_v37 }
 0x2ae   : > { %v1017_v41 = vadd.f32 %v3626_v38, %v3296_v9  ;;  %v1011_v42 = vpop.f32.mrb[21].mxu1  ;;  %3654 = vmatmul.mubr.msk.f32.gmra.mrb[22].mxu0 %vm622_vm0, %v1007_v35 }
 0x2af   : > { %v1012_v44 = vadd.f32 %v3296_v9, %v1011_v42 }
 0x2b1   : > { %3656 = vmatprep.mubr.msk.f32.mxu0 %vm622_vm0, %v1012_v44 }
 0x2b2   : > { %3657 = vmatmul.mubr.msk.f32.gmra.mrb[24].mxu0 %vm622_vm0, %v1017_v41 }
 0x369   : > { %v3637_v47 = vpop.f32.mrb[10].mxu0 }
 0x36a   : > { %v1151_v48 = vadd.f32 %v3637_v47, %v3313_v45  ;;  %v1145_v50 = vpop.f32.mrb[11].mxu0 }
 0x36b   : > { %v1146_v51 = vadd.f32 %v3313_v45, %v1145_v50 }
 0x36c   : > { %v1225_v57 = vmax.f32 %v1151_v48, 0.0  ;;  %v4853_v48 = vld [vmem:[#allocation13] ss:$0 sm:$0xff] }
 0x36d   : > { %v1224_v53 = vmax.f32 %v1146_v51, 0.0  ;;  %v3640_v55 = vpop.f32.mrb[12].mxu0 }
 0x36e   : > { %v1161_v59 = vadd.f32 %v3640_v55, %v3313_v45  ;;  %v1155_v3 = vpop.f32.mrb[13].mxu0 }
 0x36f   : > { %v1156_v4 = vadd.f32 %v3313_v45, %v1155_v3  ;;  %3667 = vmatprep.mubr.msk.f32.mxu1 %vm622_vm0, %v1224_v53 }
 0x370   : > { %3668 = vmatmul.mubr.msk.f32.vlgmr.msra.gmra.mrb[22].mxu1 %vm622_vm0, %v1225_v57  ;;  %v1227_v7 = vmax.f32 %v1161_v59, 0.0 }
 0x371   : > { %v1226_v5 = vmax.f32 %v1156_v4, 0.0  ;;  %v3643_v6 = vpop.f32.mrb[14].mxu0 }
 0x372   : > { %v1171_v8 = vadd.f32 %v3643_v6, %v3313_v45  ;;  %v1165_v9 = vpop.f32.mrb[15].mxu0 }
 0x373   : > { %v1166_v10 = vadd.f32 %v3313_v45, %v1165_v9  ;;  %3670 = vmatprep.mubr.msk.f32.mxu1 %vm622_vm0, %v1226_v5 }
 0x374   : > { %v1229_v11 = vmax.f32 %v1171_v8, 0.0  ;;  %3671 = vmatmul.mubr.msk.f32.gmra.mrb[24].mxu1 %vm622_vm0, %v1227_v7 }
 0x375   : > { %v1228_v12 = vmax.f32 %v1166_v10, 0.0  ;;  %v3646_v13 = vpop.f32.mrb[16].mxu0 }
 0x376   : > { %v1181_v14 = vadd.f32 %v3646_v13, %v3313_v45  ;;  %v1175_v15 = vpop.f32.mrb[17].mxu0 }
 0x377   : > { %v1176_v16 = vadd.f32 %v3313_v45, %v1175_v15  ;;  %3673 = vmatprep.mubr.msk.f32.mxu1 %vm622_vm0, %v1228_v12 }
 0x378   : > { %v1231_v17 = vmax.f32 %v1181_v14, 0.0  ;;  %3674 = vmatmul.mubr.msk.f32.gmra.mrb[26].mxu1 %vm622_vm0, %v1229_v11 }
 0x379   : > { %v1230_v18 = vmax.f32 %v1176_v16, 0.0  ;;  %v3649_v19 = vpop.f32.mrb[18].mxu0 }
 0x37a   : > { %v1191_v20 = vadd.f32 %v3649_v19, %v3313_v45  ;;  %v1185_v21 = vpop.f32.mrb[19].mxu0 }
 0x37b   : > { %v1186_v22 = vadd.f32 %v3313_v45, %v1185_v21  ;;  %3676 = vmatprep.mubr.msk.f32.mxu1 %vm622_vm0, %v1230_v18 }
 0x37c   : > { %v1233_v23 = vmax.f32 %v1191_v20, 0.0  ;;  %3677 = vmatmul.mubr.msk.f32.gmra.mrb[28].mxu1 %vm622_vm0, %v1231_v17 }
 0x37d   : > { %v1232_v24 = vmax.f32 %v1186_v22, 0.0  ;;  %v3652_v25 = vpop.f32.mrb[20].mxu0 }
 0x37e   : > { %v1201_v26 = vadd.f32 %v3652_v25, %v3313_v45  ;;  %v1195_v27 = vpop.f32.mrb[21].mxu0 }
 0x37f   : > { %v1196_v28 = vadd.f32 %v3313_v45, %v1195_v27  ;;  %3679 = vmatprep.mubr.msk.f32.mxu1 %vm622_vm0, %v1232_v24 }
 0x380   : > { %v1235_v29 = vmax.f32 %v1201_v26, 0.0  ;;  %3680 = vmatmul.mubr.msk.f32.gmra.mrb[30].mxu1 %vm622_vm0, %v1233_v23 }
 0x381   : > { %v1234_v30 = vmax.f32 %v1196_v28, 0.0  ;;  %v3655_v31 = vpop.f32.mrb[22].mxu0 }
 0x382   : > { %v1211_v32 = vadd.f32 %v3655_v31, %v3313_v45  ;;  %v1205_v33 = vpop.f32.mrb[23].mxu0 }
 0x383   : > { %v1206_v34 = vadd.f32 %v3313_v45, %v1205_v33  ;;  %3682 = vmatprep.mubr.msk.f32.mxu1 %vm622_vm0, %v1234_v30 }
 0x384   : > { %v1237_v35 = vmax.f32 %v1211_v32, 0.0  ;;  %3683 = vmatmul.mubr.msk.f32.gmra.mrb[32].mxu1 %vm622_vm0, %v1235_v29 }
 0x385   : > { %v1236_v36 = vmax.f32 %v1206_v34, 0.0  ;;  %v3658_v37 = vpop.f32.mrb[24].mxu0 }
 0x386   : > { %v1221_v38 = vadd.f32 %v3658_v37, %v3313_v45  ;;  %v1215_v41 = vpop.f32.mrb[25].mxu0 }
 0x387   : > { %v1216_v42 = vadd.f32 %v3313_v45, %v1215_v41  ;;  %3685 = vmatprep.mubr.msk.f32.mxu1 %vm622_vm0, %v1236_v36 }
 0x388   : > { %v1239_v44 = vmax.f32 %v1221_v38, 0.0  ;;  %3686 = vmatmul.mubr.msk.f32.gmra.mrb[34].mxu1 %vm622_vm0, %v1237_v35 }
 0x389   : > { %v1238_v47 = vmax.f32 %v1216_v42, 0.0 }
 0x38b   : > { %3688 = vmatprep.mubr.msk.f32.mxu1 %vm622_vm0, %v1238_v47 }
 0x38c   : > { %3689 = vmatmul.mubr.msk.f32.gmra.mrb[36].mxu1 %vm622_vm0, %v1239_v44 }
 0x443   : > { %v3669_v50 = vpop.f32.mrb[22].mxu1 }
 0x444   : > { %v1365_v51 = vpop.f32.mrb[23].mxu1  ;;  %v1371_v53 = vadd.f32 %v3669_v50, %v4853_v48 }
 0x445   : > { %v1366_v55 = vadd.f32 %v4853_v48, %v1365_v51 }
 0x446   : > { %v4865_v6 = vadd.f32 %v1371_v53, %v4756_v40 }
 0x447   : > { %v3672_v57 = vpop.f32.mrb[24].mxu1  ;;  %v4858_v45 = vadd.f32 %v1366_v55, %v4754_v39  ;;  %v1717_v55 = vld [vmem:[#allocation7 + $0x28] sm:$0xff] }
 0x448   : > { %v1375_v59 = vpop.f32.mrb[25].mxu1  ;;  %v1381_v3 = vadd.f32 %v3672_v57, %v4853_v48  ;;  %v1463_v12 = vsel %vm622_vm0, %v4865_v6, 0.0 }
 0x449   : > { %v1376_v4 = vadd.f32 %v4853_v48, %v1375_v59  ;;  %v1460_v5 = vsel %vm622_vm0, %v4858_v45, 0.0 }
 0x44a   : > { %1461 = vadd.xlane.f32.xlu0 %v1460_v5  ;;  %v4877_v13 = vadd.f32 %v1381_v3, %v4760_v43 }
 0x44b   : > { %v3675_v7 = vpop.f32.mrb[26].mxu1  ;;  %v4868_v8 = vadd.f32 %v1376_v4, %v4764_v46 }
 0x44c   : > { %v1391_v9 = vadd.f32 %v3675_v7, %v4853_v48  ;;  %v1385_v39 = vpop.f32.mrb[27].mxu1  ;;  %v1469_v18 = vsel %vm622_vm0, %v4877_v13, 0.0 }
 0x44d   : > { %v1386_v10 = vadd.f32 %v4853_v48, %v1385_v39  ;;  %v1466_v11 = vsel %vm622_vm0, %v4868_v8, 0.0 }
 0x44e   : > { %1467 = vadd.xlane.f32.xlu1 %v1466_v11  ;;  %1464 = vadd.xlane.f32.xlu0 %v1463_v12  ;;  %v4883_v15 = vadd.f32 %v1391_v9, %v4768_v49 }
 0x44f   : > { %v3678_v40 = vpop.f32.mrb[28].mxu1  ;;  %v4880_v46 = vadd.f32 %v1386_v10, %v4772_v52 }
 0x450   : > { %v1395_v14 = vpop.f32.mrb[29].mxu1  ;;  %v1401_v16 = vadd.f32 %v3678_v40, %v4853_v48  ;;  %v1475_v49 = vsel %vm622_vm0, %v4883_v15, 0.0 }
 0x451   : > { %v1396_v17 = vadd.f32 %v4853_v48, %v1395_v14  ;;  %v1472_v43 = vsel %vm622_vm0, %v4880_v46, 0.0 }
 0x452   : > { %1470 = vadd.xlane.f32.xlu1 %v1469_v18  ;;  %1473 = vadd.xlane.f32.xlu0 %v1472_v43  ;;  %v4901_v24 = vadd.f32 %v1401_v16, %v4776_v54 }
 0x453   : > { %v3681_v19 = vpop.f32.mrb[30].mxu1  ;;  %v4892_v52 = vadd.f32 %v1396_v17, %v4780_v56 }
 0x454   : > { %v1405_v20 = vpop.f32.mrb[31].mxu1  ;;  %v1411_v21 = vadd.f32 %v3681_v19, %v4853_v48  ;;  %v1481_v29 = vsel %vm622_vm0, %v4901_v24, 0.0 }
 0x455   : > { %v1406_v22 = vadd.f32 %v4853_v48, %v1405_v20  ;;  %v1478_v23 = vsel %vm622_vm0, %v4892_v52, 0.0 }
 0x456   : > { %1476 = vadd.xlane.f32.xlu1 %v1475_v49  ;;  %1479 = vadd.xlane.f32.xlu0 %v1478_v23  ;;  %v4913_v54 = vadd.f32 %v1411_v21, %v4784_v58 }
 0x457   : > { %v3684_v25 = vpop.f32.mrb[32].mxu1  ;;  %v4904_v56 = vadd.f32 %v1406_v22, %v4788_v60 }
 0x458   : > { %v1421_v26 = vadd.f32 %v3684_v25, %v4853_v48  ;;  %v1415_v27 = vpop.f32.mrb[33].mxu1  ;;  %v1487_v36 = vsel %vm622_vm0, %v4913_v54, 0.0 }
 0x459   : > { %v1416_v28 = vadd.f32 %v4853_v48, %v1415_v27  ;;  %v1484_v30 = vsel %vm622_vm0, %v4904_v56, 0.0 }
 0x45a   : > { %1482 = vadd.xlane.f32.xlu1 %v1481_v29  ;;  %1485 = vadd.xlane.f32.xlu0 %v1484_v30  ;;  %v4919_v33 = vadd.f32 %v1421_v26, %v4794_v62 }
 0x45b   : > { %v3687_v31 = vpop.f32.mrb[34].mxu1  ;;  %v4916_v60 = vadd.f32 %v1416_v28, %v4790_v61 }
 0x45c   : > { %v1425_v32 = vpop.f32.mrb[35].mxu1  ;;  %v1431_v34 = vadd.f32 %v3687_v31, %v4853_v48  ;;  %v1493_v62 = vsel %vm622_vm0, %v4919_v33, 0.0 }
 0x45d   : > { %v1426_v35 = vadd.f32 %v4853_v48, %v1425_v32  ;;  %v1490_v58 = vsel %vm622_vm0, %v4916_v60, 0.0 }
 0x45e   : > { %1488 = vadd.xlane.f32.xlu1 %v1487_v36  ;;  %1491 = vadd.xlane.f32.xlu0 %v1490_v58  ;;  %v4937_v47 = vadd.f32 %v1431_v34, %v4802_v0 }
 0x45f   : > { %v3690_v37 = vpop.f32.mrb[36].mxu1  ;;  %v4928_v61 = vadd.f32 %v1426_v35, %v4800_v63 }
 0x460   : > { %v1435_v38 = vpop.f32.mrb[37].mxu1  ;;  %v1441_v41 = vadd.f32 %v3690_v37, %v4853_v48  ;;  %v1499_v63 = vsel %vm622_vm0, %v4937_v47, 0.0 }
 0x461   : > { %v1436_v42 = vadd.f32 %v4853_v48, %v1435_v38  ;;  %v1496_v44 = vsel %vm622_vm0, %v4928_v61, 0.0  ;;  %v1716_v48 = vld [vmem:[#allocation7 + $0x20] sm:$0xff] }
 0x462   : > { %1494 = vadd.xlane.f32.xlu1 %v1493_v62  ;;  %1497 = vadd.xlane.f32.xlu0 %v1496_v44  ;;  %v4947_v53 = vadd.f32 %v1441_v41, %v4810_v2  ;;  %v3830_v57 = vpack.c.bf16 %v1717_v55, %v1716_v48 }
 0x463   : > { %v4940_v50 = vadd.f32 %v1436_v42, %v4808_v1 }
 0x464   : > { %v1505_v0 = vsel %vm622_vm0, %v4947_v53, 0.0  ;;  %3831 = vmatprep.subr.bf16.mxu0 %v3830_v57 }
 0x465   : > { %v1502_v51 = vsel %vm622_vm0, %v4940_v50, 0.0  ;;  %3833 = vmatpush3.bf16.msra.mxu0 %v3830_v57 }
 0x466   : > { %1500 = vadd.xlane.f32.xlu1 %v1499_v63  ;;  %1503 = vadd.xlane.f32.xlu0 %v1502_v51 }
 0x46a   : > { %1506 = vadd.xlane.f32.xlu1 %v1505_v0 }
 0x4d7   : > { %v1462_v1 = vpop.xlane.xlu0 %1461 }
 0x4d8   : > { %v1509_v59 = vmul.f32 0.03125, %v1462_v1 }
 0x4da   : > { %v4952_v3 = vsub.f32 %v4858_v45, %v1509_v59 }
 0x4db   : > { %v1468_v4 = vpop.xlane.xlu1 %1467  ;;  %v1465_v5 = vpop.xlane.xlu0 %1464 }
 0x4dc   : > { %v1511_v2 = vmul.f32 0.03125, %v1468_v4  ;;  %v1510_v7 = vmul.f32 0.03125, %v1465_v5  ;;  %v1541_v9 = vmul.f32 %v4952_v3, %v4952_v3 }
 0x4de   : > { %v4957_v39 = vsub.f32 %v4868_v8, %v1511_v2  ;;  %v4960_v10 = vsub.f32 %v4865_v6, %v1510_v7  ;;  %v1557_v11 = vsel %vm622_vm0, %v1541_v9, 0.0 }
 0x4df   : > { %v1471_v12 = vpop.xlane.xlu1 %1470  ;;  %1558 = vadd.xlane.f32.xlu0 %v1557_v11  ;;  %v1474_v40 = vpop.xlane.xlu0 %1473 }
 0x4e0   : > { %v1512_v45 = vmul.f32 0.03125, %v1471_v12  ;;  %v1513_v14 = vmul.f32 0.03125, %v1474_v40  ;;  %v1543_v16 = vmul.f32 %v4957_v39, %v4957_v39  ;;  %v1542_v17 = vmul.f32 %v4960_v10, %v4960_v10 }
 0x4e2   : > { %v4968_v18 = vsub.f32 %v4877_v13, %v1512_v45  ;;  %v4971_v8 = vsub.f32 %v4880_v46, %v1513_v14  ;;  %v1563_v6 = vsel %vm622_vm0, %v1543_v16, 0.0  ;;  %v1560_v43 = vsel %vm622_vm0, %v1542_v17, 0.0 }
 0x4e3   : > { %v1477_v19 = vpop.xlane.xlu1 %1476  ;;  %1564 = vadd.xlane.f32.xlu0 %v1563_v6  ;;  %1561 = vadd.xlane.f32.xlu1 %v1560_v43  ;;  %v1480_v20 = vpop.xlane.xlu0 %1479 }
 0x4e4   : > { %v1514_v49 = vmul.f32 0.03125, %v1477_v19  ;;  %v1515_v21 = vmul.f32 0.03125, %v1480_v20  ;;  %v1544_v22 = vmul.f32 %v4968_v18, %v4968_v18  ;;  %v1545_v13 = vmul.f32 %v4971_v8, %v4971_v8  ;;  %v1718_v20 = vld [vmem:[#allocation7 + $0x30] sm:$0xff] }
 0x4e6   : > { %v4980_v23 = vsub.f32 %v4883_v15, %v1514_v49  ;;  %v4983_v46 = vsub.f32 %v4892_v52, %v1515_v21  ;;  %v1566_v25 = vsel %vm622_vm0, %v1544_v22, 0.0  ;;  %v1569_v26 = vsel %vm622_vm0, %v1545_v13, 0.0  ;;  %v1719_v49 = vld [vmem:[#allocation7 + $0x38] sm:$0xff]  ;;  %v1922_v22 = vld [vmem:[#allocation8 + $0x20] sm:$0xff]  ;;  %v1924_v13 = vld [vmem:[#allocation8 + $0x30] sm:$0xff] }
 0x4e7   : > { %v1483_v27 = vpop.xlane.xlu1 %1482  ;;  %1567 = vadd.xlane.f32.xlu1 %v1566_v25  ;;  %1570 = vadd.xlane.f32.xlu0 %v1569_v26  ;;  %v1486_v28 = vpop.xlane.xlu0 %1485  ;;  %v3834_v21 = vpack.c.bf16 %v1719_v49, %v1718_v20  ;;  %v1925_v26 = vld [vmem:[#allocation8 + $0x38] sm:$0xff] }
 0x4e8   : > { %v1516_v29 = vmul.f32 0.03125, %v1483_v27  ;;  %v1517_v30 = vmul.f32 0.03125, %v1486_v28  ;;  %v1546_v31 = vmul.f32 %v4980_v23, %v4980_v23  ;;  %v1547_v15 = vmul.f32 %v4983_v46, %v4983_v46 }
 0x4e9   : > { %3835 = vmatprep.subr.bf16.mxu0 %v3834_v21  ;;  %v3842_v27 = vpack.c.bf16 %v1925_v26, %v1924_v13 }
 0x4ea   : > { %v4992_v32 = vsub.f32 %v4901_v24, %v1516_v29  ;;  %v4995_v52 = vsub.f32 %v4904_v56, %v1517_v30  ;;  %v1572_v34 = vsel %vm622_vm0, %v1546_v31, 0.0  ;;  %v1575_v35 = vsel %vm622_vm0, %v1547_v15, 0.0  ;;  %3837 = vmatpush3.bf16.msra.mxu0 %v3834_v21 }
 0x4eb   : > { %v1489_v36 = vpop.xlane.xlu1 %1488  ;;  %1573 = vadd.xlane.f32.xlu1 %v1572_v34  ;;  %1576 = vadd.xlane.f32.xlu0 %v1575_v35  ;;  %v1492_v58 = vpop.xlane.xlu0 %1491 }
 0x4ec   : > { %v1518_v37 = vmul.f32 0.03125, %v1489_v36  ;;  %v1519_v38 = vmul.f32 0.03125, %v1492_v58  ;;  %v1548_v62 = vmul.f32 %v4992_v32, %v4992_v32  ;;  %v1549_v24 = vmul.f32 %v4995_v52, %v4995_v52 }
 0x4ee   : > { %v5004_v41 = vsub.f32 %v4913_v54, %v1518_v37  ;;  %v5007_v56 = vsub.f32 %v4916_v60, %v1519_v38  ;;  %v1578_v42 = vsel %vm622_vm0, %v1548_v62, 0.0  ;;  %v1581_v44 = vsel %vm622_vm0, %v1549_v24, 0.0 }
 0x4ef   : > { %v1495_v63 = vpop.xlane.xlu1 %1494  ;;  %1579 = vadd.xlane.f32.xlu1 %v1578_v42  ;;  %1582 = vadd.xlane.f32.xlu0 %v1581_v44  ;;  %v1498_v51 = vpop.xlane.xlu0 %1497 }
 0x4f0   : > { %v1520_v0 = vmul.f32 0.03125, %v1495_v63  ;;  %v1521_v48 = vmul.f32 0.03125, %v1498_v51  ;;  %v1550_v55 = vmul.f32 %v5004_v41, %v5004_v41  ;;  %v1551_v54 = vmul.f32 %v5007_v56, %v5007_v56 }
 0x4f2   : > { %v5016_v57 = vsub.f32 %v4919_v33, %v1520_v0  ;;  %v5019_v60 = vsub.f32 %v4928_v61, %v1521_v48  ;;  %v1584_v1 = vsel %vm622_vm0, %v1550_v55, 0.0  ;;  %v1587_v59 = vsel %vm622_vm0, %v1551_v54, 0.0  ;;  %v5050_v54 = vld [vmem:[%s5715_s10] ss:$0 sm:$0xff] }
 0x4f3   : > { %v1501_v4 = vpop.xlane.xlu1 %1500  ;;  %1585 = vadd.xlane.f32.xlu1 %v1584_v1  ;;  %1588 = vadd.xlane.f32.xlu0 %v1587_v59  ;;  %v1504_v5 = vpop.xlane.xlu0 %1503 }
 0x4f4   : > { %v1522_v2 = vmul.f32 0.03125, %v1501_v4  ;;  %v1523_v7 = vmul.f32 0.03125, %v1504_v5  ;;  %v1552_v9 = vmul.f32 %v5016_v57, %v5016_v57  ;;  %v1553_v33 = vmul.f32 %v5019_v60, %v5019_v60 }
 0x4f6   : > { %v5028_v11 = vsub.f32 %v4937_v47, %v1522_v2  ;;  %v5031_v61 = vsub.f32 %v4940_v50, %v1523_v7  ;;  %v1590_v12 = vsel %vm622_vm0, %v1552_v9, 0.0  ;;  %v1593_v40 = vsel %vm622_vm0, %v1553_v33, 0.0  ;;  %v5056_v7 = vld [vmem:[%s5753_s12] ss:$0 sm:$0xff] }
 0x4f7   : > { %v1507_v45 = vpop.xlane.xlu1 %1506  ;;  %1591 = vadd.xlane.f32.xlu1 %v1590_v12  ;;  %1594 = vadd.xlane.f32.xlu0 %v1593_v40 }
 0x4f8   : > { %v1524_v14 = vmul.f32 0.03125, %v1507_v45  ;;  %v1554_v16 = vmul.f32 %v5028_v11, %v5028_v11  ;;  %v1555_v17 = vmul.f32 %v5031_v61, %v5031_v61 }
 0x4fa   : > { %v5040_v47 = vsub.f32 %v4947_v53, %v1524_v14  ;;  %v1596_v50 = vsel %vm622_vm0, %v1554_v16, 0.0  ;;  %v1599_v6 = vsel %vm622_vm0, %v1555_v17, 0.0  ;;  %v1923_v53 = vld [vmem:[#allocation8 + $0x28] sm:$0xff] }
 0x4fb   : > { %1597 = vadd.xlane.f32.xlu1 %v1596_v50  ;;  %1600 = vadd.xlane.f32.xlu0 %v1599_v6  ;;  %v3838_v25 = vpack.c.bf16 %v1923_v53, %v1922_v22 }
 0x4fc   : > { %v1556_v43 = vmul.f32 %v5040_v47, %v5040_v47 }
 0x4fd   : > { %3839 = vmatprep.subr.bf16.mxu1 %v3838_v25 }
 0x4fe   : > { %v1602_v19 = vsel %vm622_vm0, %v1556_v43, 0.0  ;;  %3841 = vmatpush3.bf16.msra.mxu1 %v3838_v25 }
 0x4ff   : > { %1603 = vadd.xlane.f32.xlu1 %v1602_v19  ;;  %3843 = vmatprep.subr.bf16.mxu1 %v3842_v27 }
 0x502   : > { %3845 = vmatpush3.bf16.msra.mxu1 %v3842_v27 }
 0x56c   : > { %v1559_v28 = vpop.xlane.xlu0 %1558 }
 0x56d   : > { %v1605_v29 = vmul.f32 0.03125, %v1559_v28 }
 0x56f   : > { %v1621_v30 = vadd.f32 1e-05, %v1605_v29 }
 0x570   : > { %v1562_v31 = vpop.xlane.xlu1 %1561  ;;  %v1565_v15 = vpop.xlane.xlu0 %1564 }
 0x571   : > { %3983 = vrsqrt.f32 %v1621_v30  ;;  %v1606_v34 = vmul.f32 0.03125, %v1562_v31  ;;  %v1607_v35 = vmul.f32 0.03125, %v1565_v15 }
 0x573   : > { %v1622_v36 = vadd.f32 1e-05, %v1606_v34  ;;  %v1623_v58 = vadd.f32 1e-05, %v1607_v35 }
 0x574   : > { %v1568_v37 = vpop.xlane.xlu1 %1567  ;;  %v1571_v38 = vpop.xlane.xlu0 %1570 }
 0x575   : > { %3985 = vrsqrt.f32 %v1622_v36  ;;  %v1608_v62 = vmul.f32 0.03125, %v1568_v37  ;;  %v1609_v24 = vmul.f32 0.03125, %v1571_v38 }
 0x576   : > { %3987 = vrsqrt.f32 %v1623_v58 }
 0x577   : > { %v1624_v42 = vadd.f32 1e-05, %v1608_v62  ;;  %v1625_v44 = vadd.f32 1e-05, %v1609_v24 }
 0x578   : > { %v1574_v63 = vpop.xlane.xlu1 %1573  ;;  %v1577_v51 = vpop.xlane.xlu0 %1576 }
 0x579   : > { %3989 = vrsqrt.f32 %v1624_v42  ;;  %v1610_v0 = vmul.f32 0.03125, %v1574_v63  ;;  %v1611_v48 = vmul.f32 0.03125, %v1577_v51 }
 0x57a   : > { %3991 = vrsqrt.f32 %v1625_v44 }
 0x57b   : > { %v3984_v55 = vpop.eup %3983  ;;  %v1626_v1 = vadd.f32 1e-05, %v1610_v0  ;;  %v1627_v59 = vadd.f32 1e-05, %v1611_v48 }
 0x57c   : > { %v1580_v4 = vpop.xlane.xlu1 %1579  ;;  %v1583_v5 = vpop.xlane.xlu0 %1582  ;;  %v1653_v2 = vmul.f32 %v3984_v55, %v4952_v3 }
 0x57d   : > { %3993 = vrsqrt.f32 %v1626_v1  ;;  %v1612_v9 = vmul.f32 0.03125, %v1580_v4  ;;  %v1613_v33 = vmul.f32 0.03125, %v1583_v5 }
 0x57e   : > { %3995 = vrsqrt.f32 %v1627_v59  ;;  %v1676_v12 = vmul.f32 %v5050_v54, %v1653_v2 }
 0x57f   : > { %v3986_v40 = vpop.eup %3985  ;;  %v1628_v45 = vadd.f32 1e-05, %v1612_v9  ;;  %v1629_v14 = vadd.f32 1e-05, %v1613_v33 }
 0x580   : > { %v3988_v16 = vpop.eup %3987  ;;  %v1654_v17 = vmul.f32 %v3986_v40, %v4960_v10  ;;  %v1586_v50 = vpop.xlane.xlu1 %1585  ;;  %v5061_v3 = vadd.f32 %v5056_v7, %v1676_v12 }
 0x581   : > { %v1589_v6 = vpop.xlane.xlu0 %1588  ;;  %3997 = vrsqrt.f32 %v1628_v45  ;;  %v1614_v43 = vmul.f32 0.03125, %v1586_v50  ;;  %v1655_v20 = vmul.f32 %v3988_v16, %v4957_v39 }
 0x582   : > { %v1615_v19 = vmul.f32 0.03125, %v1589_v6  ;;  %v1677_v49 = vmul.f32 %v5050_v54, %v1654_v17  ;;  %3999 = vrsqrt.f32 %v1629_v14  ;;  %3699 = vmatprep.mubr.msk.f32.mxu0 %vm622_vm0, %v5061_v3 }
 0x583   : > { %v3990_v21 = vpop.eup %3989  ;;  %v1630_v22 = vadd.f32 1e-05, %v1614_v43  ;;  %v1678_v10 = vmul.f32 %v5050_v54, %v1655_v20 }
 0x584   : > { %v1631_v53 = vadd.f32 1e-05, %v1615_v19  ;;  %v3992_v13 = vpop.eup %3991  ;;  %v5069_v25 = vadd.f32 %v5056_v7, %v1677_v49  ;;  %v1592_v26 = vpop.xlane.xlu1 %1591  ;;  %v1656_v28 = vmul.f32 %v3990_v21, %v4968_v18 }
 0x585   : > { %v1595_v27 = vpop.xlane.xlu0 %1594  ;;  %4001 = vrsqrt.f32 %v1630_v22  ;;  %v1616_v39 = vmul.f32 0.03125, %v1592_v26  ;;  %v5073_v30 = vadd.f32 %v5056_v7, %v1678_v10  ;;  %v1657_v15 = vmul.f32 %v3992_v13, %v4971_v8 }
 0x586   : > { %v1617_v29 = vmul.f32 0.03125, %v1595_v27  ;;  %4003 = vrsqrt.f32 %v1631_v53  ;;  %3700 = vmatmul.mubr.msk.f32.vlgmr.msra.gmra.mrb[26].mxu0 %vm622_vm0, %v5069_v25  ;;  %v1679_v31 = vmul.f32 %v5050_v54, %v1656_v28 }
 0x587   : > { %v3994_v34 = vpop.eup %3993  ;;  %v1632_v35 = vadd.f32 1e-05, %v1616_v39  ;;  %3702 = vmatprep.mubr.msk.f32.mxu0 %vm622_vm0, %v5073_v30  ;;  %v1680_v62 = vmul.f32 %v5050_v54, %v1657_v15 }
 0x588   : > { %v1633_v36 = vadd.f32 1e-05, %v1617_v29  ;;  %v3996_v18 = vpop.eup %3995  ;;  %v1598_v58 = vpop.xlane.xlu1 %1597  ;;  %v5082_v38 = vadd.f32 %v5056_v7, %v1679_v31  ;;  %v1658_v24 = vmul.f32 %v3994_v34, %v4980_v23  ;;  %v2144_v34 = vld [vmem:[#allocation11 + $0x20] sm:$0xff] }
 0x589   : > { %v1601_v37 = vpop.xlane.xlu0 %1600  ;;  %4005 = vrsqrt.f32 %v1632_v35  ;;  %v1618_v42 = vmul.f32 0.03125, %v1598_v58  ;;  %v1659_v8 = vmul.f32 %v3996_v18, %v4983_v46  ;;  %v5090_v63 = vadd.f32 %v5056_v7, %v1680_v62  ;;  %v2145_v35 = vld [vmem:[#allocation11 + $0x28] sm:$0xff]  ;;  %v2147_v18 = vld [vmem:[#allocation11 + $0x38] sm:$0xff] }
 0x58a   : > { %v1619_v44 = vmul.f32 0.03125, %v1601_v37  ;;  %4007 = vrsqrt.f32 %v1633_v36  ;;  %3703 = vmatmul.mubr.msk.f32.gmra.mrb[28].mxu0 %vm622_vm0, %v5082_v38  ;;  %v1681_v51 = vmul.f32 %v5050_v54, %v1658_v24  ;;  %v3846_v36 = vpack.c.bf16 %v2145_v35, %v2144_v34 }
 0x58b   : > { %v3998_v0 = vpop.eup %3997  ;;  %v1634_v48 = vadd.f32 1e-05, %v1618_v42  ;;  %v1682_v1 = vmul.f32 %v5050_v54, %v1659_v8  ;;  %3705 = vmatprep.mubr.msk.f32.mxu0 %vm622_vm0, %v5090_v63 }
 0x58c   : > { %v1635_v55 = vadd.f32 1e-05, %v1619_v44  ;;  %v4000_v23 = vpop.eup %3999  ;;  %v1604_v59 = vpop.xlane.xlu1 %1603  ;;  %v5097_v46 = vadd.f32 %v5056_v7, %v1681_v51  ;;  %v1660_v4 = vmul.f32 %v3998_v0, %v4992_v32  ;;  %3847 = vmatprep.subr.bf16.mxu0 %v3846_v36 }
 0x58d   : > { %4009 = vrsqrt.f32 %v1634_v48  ;;  %v1620_v5 = vmul.f32 0.03125, %v1604_v59  ;;  %v5101_v2 = vadd.f32 %v5056_v7, %v1682_v1  ;;  %v1661_v9 = vmul.f32 %v4000_v23, %v4995_v52  ;;  %3849 = vmatpush3.bf16.msra.mxu0 %v3846_v36 }
 0x58e   : > { %4011 = vrsqrt.f32 %v1635_v55  ;;  %3706 = vmatmul.mubr.msk.f32.gmra.mrb[30].mxu0 %vm622_vm0, %v5097_v46  ;;  %v1683_v33 = vmul.f32 %v5050_v54, %v1660_v4 }
 0x58f   : > { %v4002_v12 = vpop.eup %4001  ;;  %v1636_v40 = vadd.f32 1e-05, %v1620_v5  ;;  %3708 = vmatprep.mubr.msk.f32.mxu0 %vm622_vm0, %v5101_v2  ;;  %v1684_v32 = vmul.f32 %v5050_v54, %v1661_v9 }
 0x590   : > { %v4004_v45 = vpop.eup %4003  ;;  %v5111_v14 = vadd.f32 %v5056_v7, %v1683_v33  ;;  %v1662_v16 = vmul.f32 %v4002_v12, %v5004_v41 }
 0x591   : > { %4013 = vrsqrt.f32 %v1636_v40  ;;  %v5115_v52 = vadd.f32 %v5056_v7, %v1684_v32  ;;  %v1663_v17 = vmul.f32 %v4004_v45, %v5007_v56 }
 0x592   : > { %3709 = vmatmul.mubr.msk.f32.gmra.mrb[32].mxu0 %vm622_vm0, %v5111_v14  ;;  %v1685_v50 = vmul.f32 %v5050_v54, %v1662_v16 }
 0x593   : > { %v4006_v6 = vpop.eup %4005  ;;  %3711 = vmatprep.mubr.msk.f32.mxu0 %vm622_vm0, %v5115_v52  ;;  %v1686_v43 = vmul.f32 %v5050_v54, %v1663_v17 }
 0x594   : > { %v4008_v19 = vpop.eup %4007  ;;  %v5125_v41 = vadd.f32 %v5056_v7, %v1685_v50  ;;  %v1664_v20 = vmul.f32 %v4006_v6, %v5016_v57 }
 0x595   : > { %v5129_v49 = vadd.f32 %v5056_v7, %v1686_v43  ;;  %v1665_v56 = vmul.f32 %v4008_v19, %v5019_v60 }
 0x596   : > { %3712 = vmatmul.mubr.msk.f32.gmra.mrb[34].mxu0 %vm622_vm0, %v5125_v41  ;;  %v1687_v21 = vmul.f32 %v5050_v54, %v1664_v20 }
 0x597   : > { %v4010_v22 = vpop.eup %4009  ;;  %3714 = vmatprep.mubr.msk.f32.mxu0 %vm622_vm0, %v5129_v49  ;;  %v1688_v53 = vmul.f32 %v5050_v54, %v1665_v56 }
 0x598   : > { %v4012_v10 = vpop.eup %4011  ;;  %v5139_v13 = vadd.f32 %v5056_v7, %v1687_v21  ;;  %v1666_v57 = vmul.f32 %v4010_v22, %v5028_v11 }
 0x599   : > { %v5143_v26 = vadd.f32 %v5056_v7, %v1688_v53  ;;  %v1667_v60 = vmul.f32 %v4012_v10, %v5031_v61  ;;  %v4340_v53 = vmov 0   ;;  %v5194_v10 = vld [vmem:[%s592_s3] sm:$0xff] }
 0x59a   : > { %3715 = vmatmul.mubr.msk.f32.gmra.mrb[36].mxu0 %vm622_vm0, %v5139_v13  ;;  %v1689_v27 = vmul.f32 %v5050_v54, %v1666_v57  ;;  %3981 = vset.pattern.permute.xlu0 %v4340_v53  ;;  %v5196_v57 = vld [vmem:[%s592_s3 + $0x8] sm:$0xff]  ;;  %vm2877_vm3 = vcmp.gt.s32.totalorder %v5194_v10, 1  ;;  %vm2939_vm5 = vcmp.gt.s32.totalorder %v5194_v10, 0  ;;  %s5757_s3 = sld [smem:[#allocation26_spill]] }
 0x59b   : > { %v4014_v28 = vpop.eup %4013  ;;  %3717 = vmatprep.mubr.msk.f32.mxu0 %vm622_vm0, %v5143_v26  ;;  %v1690_v39 = vmul.f32 %v5050_v54, %v1667_v60  ;;  %3982 = vset.pattern.permute.xlu1 %v4340_v53  ;;  %v3367_v60 = vld [vmem:[#allocation10 + $0x1] ss:$0 sm:$0xff]  ;;  %vm2879_vm4 = vcmp.gt.s32.totalorder %v5196_v57, 1  ;;  %vm2940_vm6 = vcmp.gt.s32.totalorder %v5196_v57, 0 }
 0x59c   : > { %v5153_v29 = vadd.f32 %v5056_v7, %v1689_v27  ;;  %v1668_v11 = vmul.f32 %v4014_v28, %v5040_v47  ;;  %v2146_v47 = vld [vmem:[#allocation11 + $0x30] sm:$0xff]  ;;  %2626 = vperm.xlu0 %3981, %v5194_v10   ;;  %2629 = vperm.xlu1 %3982, %v5196_v57  }
 0x59d   : > { %v5157_v31 = vadd.f32 %v5056_v7, %v1690_v39  ;;  %v3850_v58 = vpack.c.bf16 %v2147_v18, %v2146_v47 }
 0x59e   : > { %3718 = vmatmul.mubr.msk.f32.gmra.mrb[38].mxu0 %vm622_vm0, %v5153_v29  ;;  %v1691_v61 = vmul.f32 %v5050_v54, %v1668_v11  ;;  %v3350_v54 = vld [vmem:[%s5710_s5 + $0x1] ss:$0 sm:$0xff] }
 0x59f   : > { %3720 = vmatprep.mubr.msk.f32.mxu0 %vm622_vm0, %v5157_v31  ;;  %3851 = vmatprep.subr.bf16.mxu0 %v3850_v58 }
 0x5a0   : > { %v5165_v15 = vadd.f32 %v5056_v7, %v1691_v61  ;;  %3853 = vmatpush3.bf16.msra.mxu0 %v3850_v58  ;;  %s5661_s11 = scalar_lea.hbm %s5757_s3, %s3416_s13 }
 0x5a2   : > { %3721 = vmatmul.mubr.msk.f32.gmra.mrb[40].mxu0 %vm622_vm0, %v5165_v15 }
 0x659   : > { %v3701_v37 = vpop.f32.mrb[26].mxu0 }
 0x65a   : > { %v1842_v7 = vpop.f32.mrb[27].mxu0  ;;  %v1848_v24 = vadd.f32 %v3701_v37, %v3350_v54 }
 0x65b   : > { %v1843_v62 = vadd.f32 %v3350_v54, %v1842_v7 }
 0x65d   : > { %v3704_v42 = vpop.f32.mrb[28].mxu0  ;;  %3731 = vmatprep.mubr.msk.f32.mxu1 %vm622_vm0, %v1843_v62 }
 0x65e   : > { %v1852_v44 = vpop.f32.mrb[29].mxu0  ;;  %3732 = vmatmul.mubr.msk.f32.vlgmr.msra.gmra.mrb[38].mxu1 %vm622_vm0, %v1848_v24  ;;  %v1858_v51 = vadd.f32 %v3704_v42, %v3350_v54 }
 0x65f   : > { %v1853_v8 = vadd.f32 %v3350_v54, %v1852_v44 }
 0x661   : > { %v3707_v0 = vpop.f32.mrb[30].mxu0  ;;  %3734 = vmatprep.mubr.msk.f32.mxu1 %vm622_vm0, %v1853_v8 }
 0x662   : > { %v1862_v48 = vpop.f32.mrb[31].mxu0  ;;  %3735 = vmatmul.mubr.msk.f32.gmra.mrb[40].mxu1 %vm622_vm0, %v1858_v51  ;;  %v1868_v1 = vadd.f32 %v3707_v0, %v3350_v54 }
 0x663   : > { %v1863_v55 = vadd.f32 %v3350_v54, %v1862_v48 }
 0x665   : > { %v3710_v23 = vpop.f32.mrb[32].mxu0  ;;  %3737 = vmatprep.mubr.msk.f32.mxu1 %vm622_vm0, %v1863_v55 }
 0x666   : > { %v1872_v59 = vpop.f32.mrb[33].mxu0  ;;  %3738 = vmatmul.mubr.msk.f32.gmra.mrb[42].mxu1 %vm622_vm0, %v1868_v1  ;;  %v1878_v5 = vadd.f32 %v3710_v23, %v3350_v54 }
 0x667   : > { %v1873_v4 = vadd.f32 %v3350_v54, %v1872_v59 }
 0x669   : > { %v3713_v9 = vpop.f32.mrb[34].mxu0  ;;  %3740 = vmatprep.mubr.msk.f32.mxu1 %vm622_vm0, %v1873_v4 }
 0x66a   : > { %v1882_v33 = vpop.f32.mrb[35].mxu0  ;;  %3741 = vmatmul.mubr.msk.f32.gmra.mrb[44].mxu1 %vm622_vm0, %v1878_v5  ;;  %v1888_v40 = vadd.f32 %v3713_v9, %v3350_v54 }
 0x66b   : > { %v1883_v12 = vadd.f32 %v3350_v54, %v1882_v33 }
 0x66d   : > { %v3716_v32 = vpop.f32.mrb[36].mxu0  ;;  %3743 = vmatprep.mubr.msk.f32.mxu1 %vm622_vm0, %v1883_v12 }
 0x66e   : > { %v1892_v45 = vpop.f32.mrb[37].mxu0  ;;  %3744 = vmatmul.mubr.msk.f32.gmra.mrb[46].mxu1 %vm622_vm0, %v1888_v40  ;;  %v1898_v17 = vadd.f32 %v3716_v32, %v3350_v54 }
 0x66f   : > { %v1893_v16 = vadd.f32 %v3350_v54, %v1892_v45 }
 0x671   : > { %v3719_v50 = vpop.f32.mrb[38].mxu0  ;;  %3746 = vmatprep.mubr.msk.f32.mxu1 %vm622_vm0, %v1893_v16 }
 0x672   : > { %v1902_v6 = vpop.f32.mrb[39].mxu0  ;;  %3747 = vmatmul.mubr.msk.f32.gmra.mrb[48].mxu1 %vm622_vm0, %v1898_v17  ;;  %v1908_v19 = vadd.f32 %v3719_v50, %v3350_v54 }
 0x673   : > { %v1903_v43 = vadd.f32 %v3350_v54, %v1902_v6 }
 0x675   : > { %v3722_v20 = vpop.f32.mrb[40].mxu0  ;;  %3749 = vmatprep.mubr.msk.f32.mxu1 %vm622_vm0, %v1903_v43 }
 0x676   : > { %v1912_v56 = vpop.f32.mrb[41].mxu0  ;;  %3750 = vmatmul.mubr.msk.f32.gmra.mrb[50].mxu1 %vm622_vm0, %v1908_v19  ;;  %v1918_v22 = vadd.f32 %v3722_v20, %v3350_v54 }
 0x677   : > { %v1913_v21 = vadd.f32 %v3350_v54, %v1912_v56 }
 0x679   : > { %3752 = vmatprep.mubr.msk.f32.mxu1 %vm622_vm0, %v1913_v21  ;;  %v2623_v21 = vlaneseq }
 0x67a   : > { %3753 = vmatmul.mubr.msk.f32.gmra.mrb[52].mxu1 %vm622_vm0, %v1918_v22 }
 0x731   : > { %v3733_v27 = vpop.f32.mrb[38].mxu1 }
 0x732   : > { %v2054_v28 = vadd.f32 %v3733_v27, %v3367_v60  ;;  %v2048_v39 = vpop.f32.mrb[39].mxu1 }
 0x733   : > { %v2049_v11 = vadd.f32 %v3367_v60, %v2048_v39 }
 0x734   : > { %v2128_v35 = vmax.f32 %v2054_v28, 0.0 }
 0x735   : > { %v2127_v61 = vmax.f32 %v2049_v11, 0.0  ;;  %v3736_v34 = vpop.f32.mrb[40].mxu1 }
 0x736   : > { %v2064_v47 = vadd.f32 %v3736_v34, %v3367_v60  ;;  %v2058_v36 = vpop.f32.mrb[41].mxu1 }
 0x737   : > { %v2059_v18 = vadd.f32 %v3367_v60, %v2058_v36  ;;  %3763 = vmatprep.mubr.msk.f32.mxu0 %vm622_vm0, %v2127_v61  ;;  %v5214_v61 = vshrl.u32 %v2623_v21, 7  ;;  %v2627_v36 = vpop.permute.xlu0 %2626 }
 0x738   : > { %3764 = vmatmul.mubr.msk.f32.vlgmr.msra.gmra.mrb[42].mxu0 %vm622_vm0, %v2128_v35  ;;  %v2130_v37 = vmax.f32 %v2064_v47, 0.0  ;;  %v2624_v35 = vand.u32 127, %v2623_v21 }
 0x739   : > { %v2129_v58 = vmax.f32 %v2059_v18, 0.0  ;;  %v3739_v54 = vpop.f32.mrb[42].mxu1  ;;  %v2653_v47 = vsub.s32 2, %v5214_v61  ;;  %v2630_v18 = vpop.permute.xlu1 %2629 }
 0x73a   : > { %v2074_v7 = vadd.f32 %v3739_v54, %v3367_v60  ;;  %v2068_v62 = vpop.f32.mrb[43].mxu1  ;;  %vm2631_vm1 = vcmp.lt.s32.totalorder %v2624_v35, %v2627_v36  ;;  %vm2632_vm2 = vcmp.lt.s32.totalorder %v2624_v35, %v2630_v18  ;;  %v4341_v54 = vmov 0.0  }
 0x73b   : > { %v2069_v24 = vadd.f32 %v3367_v60, %v2068_v62  ;;  %3766 = vmatprep.mubr.msk.f32.mxu0 %vm622_vm0, %v2129_v58  ;;  %v2639_v58 = vsub.s32 0, %v5214_v61 }
 0x73c   : > { %3767 = vmatmul.mubr.msk.f32.gmra.mrb[44].mxu0 %vm622_vm0, %v2130_v37  ;;  %v2132_v8 = vmax.f32 %v2074_v7, 0.0  ;;  %v5221_v37 = vsel %vm2631_vm1, 1.0, %v4341_v54  ;;  %v5223_v7 = vsel %vm2632_vm2, 1.0, %v4341_v54 }
 0x73d   : > { %v2131_v42 = vmax.f32 %v2069_v24, 0.0  ;;  %v3742_v44 = vpop.f32.mrb[44].mxu1  ;;  %v2654_v62 = vrot.slane %v5221_v37, %v2653_v47 }
 0x73e   : > { %v2084_v51 = vadd.f32 %v3742_v44, %v3367_v60  ;;  %v2078_v0 = vpop.f32.mrb[45].mxu1  ;;  %v2660_v44 = vsub.s32 3, %v5214_v61 }
 0x73f   : > { %v2079_v48 = vadd.f32 %v3367_v60, %v2078_v0  ;;  %3769 = vmatprep.mubr.msk.f32.mxu0 %vm622_vm0, %v2131_v42  ;;  %2656 = vbcast.lane.b32.xlu1 %v2654_v62, 256  ;;  %v2667_v0 = vsub.s32 4, %v5214_v61 }
 0x740   : > { %3770 = vmatmul.mubr.msk.f32.gmra.mrb[46].mxu0 %vm622_vm0, %v2132_v8  ;;  %v2134_v23 = vmax.f32 %v2084_v51, 0.0  ;;  %v2640_v8 = vrot.slane %v5221_v37, %v2639_v58  ;;  %v2661_v51 = vrot.slane %v5221_v37, %v2660_v44 }
 0x741   : > { %v2133_v55 = vmax.f32 %v2079_v48, 0.0  ;;  %v3745_v1 = vpop.f32.mrb[46].mxu1  ;;  %v2710_v48 = vrot.slane %v5223_v7, %v2653_v47 }
 0x742   : > { %v2094_v59 = vadd.f32 %v3745_v1, %v3367_v60  ;;  %v2088_v4 = vpop.f32.mrb[47].mxu1  ;;  %v2681_v1 = vsub.s32 6, %v5214_v61 }
 0x743   : > { %v2089_v5 = vadd.f32 %v3367_v60, %v2088_v4  ;;  %3772 = vmatprep.mubr.msk.f32.mxu0 %vm622_vm0, %v2133_v55  ;;  %v2668_v55 = vrot.slane %v5221_v37, %v2667_v0  ;;  %v5242_v4 = vrot.slane %v5223_v7, %v2639_v58 }
 0x744   : > { %3773 = vmatmul.mubr.msk.f32.gmra.mrb[48].mxu0 %vm622_vm0, %v2134_v23  ;;  %v2136_v12 = vmax.f32 %v2094_v59, 0.0  ;;  %v5236_v23 = vrot.slane %v5223_v7, %v2660_v44  ;;  %v5239_v59 = vrot.slane %v5223_v7, %v2667_v0 }
 0x745   : > { %v2135_v9 = vmax.f32 %v2089_v5, 0.0  ;;  %v3748_v33 = vpop.f32.mrb[48].mxu1  ;;  %v5247_v5 = vrot.slane %v5223_v7, %v2681_v1 }
 0x746   : > { %v2104_v40 = vadd.f32 %v3748_v33, %v3367_v60  ;;  %v2098_v32 = vpop.f32.mrb[49].mxu1 }
 0x747   : > { %v2099_v45 = vadd.f32 %v3367_v60, %v2098_v32  ;;  %3775 = vmatprep.mubr.msk.f32.mxu0 %vm622_vm0, %v2135_v9  ;;  %v5249_v9 = vld [vmem:[#allocation13 + $0x1] ss:$0 sm:$0xff] }
 0x748   : > { %3776 = vmatmul.mubr.msk.f32.gmra.mrb[50].mxu0 %vm622_vm0, %v2136_v12  ;;  %v2138_v50 = vmax.f32 %v2104_v40, 0.0 }
 0x749   : > { %v2137_v16 = vmax.f32 %v2099_v45, 0.0  ;;  %v3751_v17 = vpop.f32.mrb[50].mxu1 }
 0x74a   : > { %v2114_v6 = vadd.f32 %v3751_v17, %v3367_v60  ;;  %v2108_v43 = vpop.f32.mrb[51].mxu1 }
 0x74b   : > { %v2109_v19 = vadd.f32 %v3367_v60, %v2108_v43  ;;  %3778 = vmatprep.mubr.msk.f32.mxu0 %vm622_vm0, %v2137_v16 }
 0x74c   : > { %3779 = vmatmul.mubr.msk.f32.gmra.mrb[52].mxu0 %vm622_vm0, %v2138_v50  ;;  %v2140_v22 = vmax.f32 %v2114_v6, 0.0 }
 0x74d   : > { %v2139_v20 = vmax.f32 %v2109_v19, 0.0  ;;  %v3754_v56 = vpop.f32.mrb[52].mxu1 }
 0x74e   : > { %v2124_v27 = vadd.f32 %v3754_v56, %v3367_v60  ;;  %v2118_v28 = vpop.f32.mrb[53].mxu1 }
 0x74f   : > { %v2119_v39 = vadd.f32 %v3367_v60, %v2118_v28  ;;  %3781 = vmatprep.mubr.msk.f32.mxu0 %vm622_vm0, %v2139_v20  ;;  %v2646_v60 = vsub.s32 1, %v5214_v61 }
 0x750   : > { %3782 = vmatmul.mubr.msk.f32.gmra.mrb[54].mxu0 %vm622_vm0, %v2140_v22  ;;  %v2142_v34 = vmax.f32 %v2124_v27, 0.0 }
 0x751   : > { %v2141_v11 = vmax.f32 %v2119_v39, 0.0  ;;  %v2647_v24 = vrot.slane %v5221_v37, %v2646_v60  ;;  %v2703_v42 = vrot.slane %v5223_v7, %v2646_v60 }
 0x753   : > { %3784 = vmatprep.mubr.msk.f32.mxu0 %vm622_vm0, %v2141_v11  ;;  %2649 = vbcast.lane.b32.xlu0 %v2647_v24, 256 }
 0x754   : > { %3785 = vmatmul.mubr.msk.f32.gmra.mrb[56].mxu0 %vm622_vm0, %v2142_v34  ;;  %2705 = vbcast.lane.b32.xlu1 %v2703_v42, 256 }
 0x757   : > { %2642 = vbcast.lane.b32.xlu0 %v2640_v8, 256 }
 0x758   : > { %2663 = vbcast.lane.b32.xlu1 %v2661_v51, 256 }
 0x75b   : > { %2712 = vbcast.lane.b32.xlu0 %v2710_v48, 256 }
 0x75c   : > { %2670 = vbcast.lane.b32.xlu1 %v2668_v55, 256 }
 0x80b   : > { %v3765_v33 = vpop.f32.mrb[42].mxu0 }
 0x80c   : > { %v2276_v12 = vadd.f32 %v3765_v33, %v5249_v9  ;;  %v2270_v40 = vpop.f32.mrb[43].mxu0 }
 0x80d   : > { %v2271_v32 = vadd.f32 %v5249_v9, %v2270_v40 }
 0x80e   : > { %v5254_v45 = vadd.f32 %v2276_v12, %v5069_v25 }
 0x80f   : > { %v3768_v16 = vpop.f32.mrb[44].mxu0  ;;  %v5257_v17 = vadd.f32 %v2271_v32, %v5061_v3 }
 0x810   : > { %v2286_v50 = vadd.f32 %v3768_v16, %v5249_v9  ;;  %v2280_v6 = vpop.f32.mrb[45].mxu0  ;;  %v2368_v43 = vsel %vm622_vm0, %v5254_v45, 0.0 }
 0x811   : > { %v2281_v19 = vadd.f32 %v5249_v9, %v2280_v6  ;;  %2369 = vadd.xlane.f32.xlu0 %v2368_v43  ;;  %v2365_v20 = vsel %vm622_vm0, %v5257_v17, 0.0 }
 0x812   : > { %2366 = vadd.xlane.f32.xlu1 %v2365_v20  ;;  %v5266_v25 = vadd.f32 %v2286_v50, %v5082_v38 }
 0x813   : > { %v3771_v56 = vpop.f32.mrb[46].mxu0  ;;  %v5269_v3 = vadd.f32 %v2281_v19, %v5073_v30 }
 0x814   : > { %v2296_v21 = vadd.f32 %v3771_v56, %v5249_v9  ;;  %v2290_v22 = vpop.f32.mrb[47].mxu0  ;;  %v2374_v27 = vsel %vm622_vm0, %v5266_v25, 0.0 }
 0x815   : > { %v2291_v28 = vadd.f32 %v5249_v9, %v2290_v22  ;;  %2375 = vadd.xlane.f32.xlu0 %v2374_v27  ;;  %v2371_v39 = vsel %vm622_vm0, %v5269_v3, 0.0 }
 0x816   : > { %2372 = vadd.xlane.f32.xlu1 %v2371_v39  ;;  %v5278_v38 = vadd.f32 %v2296_v21, %v5097_v46  ;;  %v5356_v39 = vpop.permute.xlu1 %2656 }
 0x817   : > { %v3774_v11 = vpop.f32.mrb[48].mxu0  ;;  %v5281_v30 = vadd.f32 %v2291_v28, %v5090_v63  ;;  %v2682_v28 = vrot.slane %v5221_v37, %v2681_v1 }
 0x818   : > { %v2306_v34 = vadd.f32 %v3774_v11, %v5249_v9  ;;  %v2300_v35 = vpop.f32.mrb[49].mxu0  ;;  %v2380_v47 = vsel %vm622_vm0, %v5278_v38, 0.0 }
 0x819   : > { %v2301_v36 = vadd.f32 %v5249_v9, %v2300_v35  ;;  %v2377_v18 = vsel %vm622_vm0, %v5281_v30, 0.0 }
 0x81a   : > { %2381 = vadd.xlane.f32.xlu1 %v2380_v47  ;;  %2378 = vadd.xlane.f32.xlu0 %v2377_v18  ;;  %v5290_v46 = vadd.f32 %v2306_v34, %v5111_v14 }
 0x81b   : > { %v3777_v60 = vpop.f32.mrb[50].mxu0  ;;  %v5297_v24 = vadd.f32 %v2301_v36, %v5101_v2 }
 0x81c   : > { %v2316_v63 = vadd.f32 %v3777_v60, %v5249_v9  ;;  %v2310_v58 = vpop.f32.mrb[51].mxu0  ;;  %v2386_v54 = vsel %vm622_vm0, %v5290_v46, 0.0 }
 0x81d   : > { %v2311_v62 = vadd.f32 %v5249_v9, %v2310_v58  ;;  %v2383_v48 = vsel %vm622_vm0, %v5297_v24, 0.0 }
 0x81e   : > { %2387 = vadd.xlane.f32.xlu1 %v2386_v54  ;;  %v5300_v42 = vadd.f32 %v2316_v63, %v5125_v41 }
 0x81f   : > { %v3780_v44 = vpop.f32.mrb[52].mxu0  ;;  %v5309_v2 = vadd.f32 %v2311_v62, %v5115_v52 }
 0x820   : > { %v2326_v14 = vadd.f32 %v3780_v44, %v5249_v9  ;;  %v2320_v8 = vpop.f32.mrb[53].mxu0  ;;  %v2392_v51 = vsel %vm622_vm0, %v5300_v42, 0.0 }
 0x821   : > { %v2321_v0 = vadd.f32 %v5249_v9, %v2320_v8  ;;  %2393 = vadd.xlane.f32.xlu0 %v2392_v51  ;;  %v2389_v16 = vsel %vm622_vm0, %v5309_v2, 0.0 }
 0x822   : > { %2384 = vadd.xlane.f32.xlu1 %v2383_v48  ;;  %v5312_v41 = vadd.f32 %v2326_v14, %v5139_v13 }
 0x823   : > { %v3783_v55 = vpop.f32.mrb[54].mxu0  ;;  %v5321_v52 = vadd.f32 %v2321_v0, %v5129_v49 }
 0x824   : > { %v2336_v33 = vadd.f32 %v3783_v55, %v5249_v9  ;;  %v2330_v12 = vpop.f32.mrb[55].mxu0  ;;  %v2398_v40 = vsel %vm622_vm0, %v5312_v41, 0.0 }
 0x825   : > { %v2331_v32 = vadd.f32 %v5249_v9, %v2330_v12  ;;  %2399 = vadd.xlane.f32.xlu0 %v2398_v40  ;;  %v2395_v49 = vsel %vm622_vm0, %v5321_v52, 0.0 }
 0x826   : > { %2390 = vadd.xlane.f32.xlu1 %v2389_v16  ;;  %v5324_v13 = vadd.f32 %v2336_v33, %v5153_v29 }
 0x827   : > { %v3786_v50 = vpop.f32.mrb[56].mxu0  ;;  %v5330_v20 = vadd.f32 %v2331_v32, %v5143_v26 }
 0x828   : > { %v2346_v6 = vadd.f32 %v3786_v50, %v5249_v9  ;;  %v2340_v43 = vpop.f32.mrb[57].mxu0  ;;  %v2404_v19 = vsel %vm622_vm0, %v5324_v13, 0.0 }
 0x829   : > { %v2341_v56 = vadd.f32 %v5249_v9, %v2340_v43  ;;  %2405 = vadd.xlane.f32.xlu0 %v2404_v19  ;;  %v2401_v21 = vsel %vm622_vm0, %v5330_v20, 0.0 }
 0x82a   : > { %2396 = vadd.xlane.f32.xlu1 %v2395_v49  ;;  %v5336_v29 = vadd.f32 %v2346_v6, %v5165_v15  ;;  %v2674_v15 = vsub.s32 5, %v5214_v61 }
 0x82b   : > { %v5343_v27 = vadd.f32 %v2341_v56, %v5157_v31 }
 0x82c   : > { %v2410_v22 = vsel %vm622_vm0, %v5336_v29, 0.0  ;;  %v2731_v9 = vrot.slane %v5223_v7, %v2674_v15  ;;  %v2675_v31 = vrot.slane %v5221_v37, %v2674_v15 }
 0x82d   : > { %2402 = vadd.xlane.f32.xlu0 %v2401_v21  ;;  %v2407_v26 = vsel %vm622_vm0, %v5343_v27, 0.0 }
 0x82e   : > { %2411 = vadd.xlane.f32.xlu1 %v2410_v22 }
 0x831   : > { %2408 = vadd.xlane.f32.xlu0 %v2407_v26 }
 0x83f   : > { %2719 = vbcast.lane.b32.xlu1 %v5236_v23, 256  ;;  %v5358_v23 = vpop.permute.xlu0 %2649 }
 0x843   : > { %2726 = vbcast.lane.b32.xlu1 %v5239_v59, 256  ;;  %v5360_v59 = vpop.permute.xlu1 %2705  ;;  %v5362_v11 = vpop.permute.xlu0 %2642 }
 0x847   : > { %2733 = vbcast.lane.b32.xlu1 %v2731_v9, 256  ;;  %2698 = vbcast.lane.b32.xlu0 %v5242_v4, 256  ;;  %v5364_v34 = vpop.permute.xlu1 %2663  ;;  %v5366_v35 = vpop.permute.xlu0 %2712 }
 0x84b   : > { %2677 = vbcast.lane.b32.xlu0 %v2675_v31, 256  ;;  %v5368_v4 = vpop.permute.xlu1 %2670 }
 0x84f   : > { %2684 = vbcast.lane.b32.xlu0 %v2682_v28, 256 }
 0x89e   : > { %v2370_v47 = vpop.xlane.xlu0 %2369 }
 0x89f   : > { %v2414_v36 = vmul.f32 0.03125, %v2370_v47  ;;  %v2367_v18 = vpop.xlane.xlu1 %2366 }
 0x8a0   : > { %v2413_v60 = vmul.f32 0.03125, %v2367_v18 }
 0x8a1   : > { %v5371_v1 = vsub.f32 %v5254_v45, %v2414_v36 }
 0x8a2   : > { %v5374_v63 = vsub.f32 %v5257_v17, %v2413_v60  ;;  %v2376_v58 = vpop.xlane.xlu0 %2375 }
 0x8a3   : > { %v2416_v54 = vmul.f32 0.03125, %v2376_v58  ;;  %v2373_v62 = vpop.xlane.xlu1 %2372  ;;  %v2446_v44 = vmul.f32 %v5371_v1, %v5371_v1 }
 0x8a4   : > { %v2415_v14 = vmul.f32 0.03125, %v2373_v62  ;;  %v2445_v0 = vmul.f32 %v5374_v63, %v5374_v63 }
 0x8a5   : > { %v5379_v8 = vsub.f32 %v5266_v25, %v2416_v54  ;;  %v2464_v51 = vsel %vm622_vm0, %v2446_v44, 0.0 }
 0x8a6   : > { %v5385_v45 = vsub.f32 %v5269_v3, %v2415_v14  ;;  %2465 = vadd.xlane.f32.xlu1 %v2464_v51  ;;  %v2461_v40 = vsel %vm622_vm0, %v2445_v0, 0.0 }
 0x8a7   : > { %v2382_v17 = vpop.xlane.xlu1 %2381  ;;  %v2379_v48 = vpop.xlane.xlu0 %2378  ;;  %v2448_v25 = vmul.f32 %v5379_v8, %v5379_v8 }
 0x8a8   : > { %v2418_v55 = vmul.f32 0.03125, %v2382_v17  ;;  %v2447_v33 = vmul.f32 %v5385_v45, %v5385_v45  ;;  %v2417_v12 = vmul.f32 0.03125, %v2379_v48 }
 0x8a9   : > { %v2470_v43 = vsel %vm622_vm0, %v2448_v25, 0.0 }
 0x8aa   : > { %v5393_v32 = vsub.f32 %v5278_v38, %v2418_v55  ;;  %2462 = vadd.xlane.f32.xlu1 %v2461_v40  ;;  %v2467_v3 = vsel %vm622_vm0, %v2447_v33, 0.0  ;;  %v5397_v50 = vsub.f32 %v5281_v30, %v2417_v12 }
 0x8ab   : > { %v2388_v16 = vpop.xlane.xlu1 %2387  ;;  %2468 = vadd.xlane.f32.xlu0 %v2467_v3 }
 0x8ac   : > { %v2420_v6 = vmul.f32 0.03125, %v2388_v16  ;;  %v2450_v19 = vmul.f32 %v5393_v32, %v5393_v32  ;;  %v2449_v26 = vmul.f32 %v5397_v50, %v5397_v50 }
 0x8ae   : > { %2471 = vadd.xlane.f32.xlu1 %v2470_v43  ;;  %v2394_v56 = vpop.xlane.xlu0 %2393  ;;  %v5403_v38 = vsub.f32 %v5290_v46, %v2420_v6  ;;  %v2476_v22 = vsel %vm622_vm0, %v2450_v19, 0.0  ;;  %v2473_v46 = vsel %vm622_vm0, %v2449_v26, 0.0 }
 0x8af   : > { %v2385_v49 = vpop.xlane.xlu1 %2384  ;;  %v2422_v31 = vmul.f32 0.03125, %v2394_v56 }
 0x8b0   : > { %v2419_v21 = vmul.f32 0.03125, %v2385_v49  ;;  %v2452_v36 = vmul.f32 %v5403_v38, %v5403_v38 }
 0x8b1   : > { %v5420_v54 = vsub.f32 %v5300_v42, %v2422_v31 }
 0x8b2   : > { %2477 = vadd.xlane.f32.xlu1 %v2476_v22  ;;  %v2400_v30 = vpop.xlane.xlu0 %2399  ;;  %v5409_v28 = vsub.f32 %v5297_v24, %v2419_v21 }
 0x8b3   : > { %v2424_v15 = vmul.f32 0.03125, %v2400_v30  ;;  %v2391_v9 = vpop.xlane.xlu1 %2390 }
 0x8b4   : > { %v2421_v62 = vmul.f32 0.03125, %v2391_v9  ;;  %v2451_v51 = vmul.f32 %v5409_v28, %v5409_v28 }
 0x8b5   : > { %v5412_v47 = vsub.f32 %v5312_v41, %v2424_v15  ;;  %v2482_v41 = vsel %vm622_vm0, %v2452_v36, 0.0 }
 0x8b6   : > { %2474 = vadd.xlane.f32.xlu1 %v2473_v46  ;;  %v2406_v18 = vpop.xlane.xlu0 %2405  ;;  %v5432_v48 = vsub.f32 %v5309_v2, %v2421_v62  ;;  %v2479_v12 = vsel %vm622_vm0, %v2451_v51, 0.0  ;;  %v2880_v46 = vsel %vm2879_vm4, %v5196_v57, 1 }
 0x8b7   : > { %v2426_v60 = vmul.f32 0.03125, %v2406_v18  ;;  %v2456_v58 = vmul.f32 %v5412_v47, %v5412_v47  ;;  %v2397_v24 = vpop.xlane.xlu1 %2396  ;;  %v2882_v36 = vcvt.s32.f32 %v2880_v46  ;;  %v2688_v18 = vsub.s32 7, %v5214_v61 }
 0x8b8   : > { %v2423_v55 = vmul.f32 0.03125, %v2397_v24  ;;  %v2453_v43 = vmul.f32 %v5432_v48, %v5432_v48  ;;  %v2942_v61 = vsel %vm2940_vm6, 1, %v4340_v53 }
 0x8b9   : > { %v5423_v44 = vsub.f32 %v5324_v13, %v2426_v60  ;;  %v2494_v14 = vsel %vm622_vm0, %v2456_v58, 0.0  ;;  %v2454_v13 = vmul.f32 %v5420_v54, %v5420_v54  ;;  %v2689_v60 = vrot.slane %v5221_v37, %v2688_v18  ;;  %v3006_v37 = vld [vmem:[%s5755_s18] sm:$0xff] }
 0x8ba   : > { %2483 = vadd.xlane.f32.xlu1 %v2482_v41  ;;  %2495 = vadd.xlane.f32.xlu0 %v2494_v14  ;;  %v2403_v0 = vpop.xlane.xlu0 %2402  ;;  %v2485_v26 = vsel %vm622_vm0, %v2453_v43, 0.0  ;;  %v2745_v24 = vrot.slane %v5223_v7, %v2688_v18  ;;  %v2941_v41 = vsel %vm2939_vm5, 1, %v4340_v53  ;;  %v3007_v7 = vld [vmem:[%s5755_s18 + $0x8] sm:$0xff]  ;;  %v3009_v53 = vld [vmem:[%s5755_s18 + $0x18] sm:$0xff] }
 0x8bb   : > { %v2425_v17 = vmul.f32 0.03125, %v2403_v0  ;;  %v2458_v42 = vmul.f32 %v5423_v44, %v5423_v44  ;;  %v2412_v25 = vpop.xlane.xlu1 %2411  ;;  %v2488_v6 = vsel %vm622_vm0, %v2454_v13, 0.0 }
 0x8bc   : > { %v2428_v19 = vmul.f32 0.03125, %v2412_v25 }
 0x8bd   : > { %v5437_v33 = vsub.f32 %v5330_v20, %v2425_v17  ;;  %v2500_v40 = vsel %vm622_vm0, %v2458_v42, 0.0  ;;  %v5447_v20 = vsub.f32 %v5321_v52, %v2423_v55 }
 0x8be   : > { %2480 = vadd.xlane.f32.xlu1 %v2479_v12  ;;  %2501 = vadd.xlane.f32.xlu0 %v2500_v40  ;;  %v2409_v3 = vpop.xlane.xlu0 %2408  ;;  %v5456_v22 = vsub.f32 %v5336_v29, %v2428_v19  ;;  %v2878_v29 = vsel %vm2877_vm3, %v5194_v10, 1  ;;  %v3008_v10 = vld [vmem:[%s5755_s18 + $0x10] sm:$0xff] }
 0x8bf   : > { %v2427_v16 = vmul.f32 0.03125, %v2409_v3  ;;  %v2457_v2 = vmul.f32 %v5437_v33, %v5437_v33  ;;  %v2455_v52 = vmul.f32 %v5447_v20, %v5447_v20  ;;  %v2881_v31 = vcvt.s32.f32 %v2878_v29  ;;  %v5490_v14 = vpop.permute.xlu1 %2719 }
 0x8c0   : > { %v2460_v15 = vmul.f32 %v5456_v22, %v5456_v22  ;;  %v3858_v57 = vpack.c.bf16 %v3009_v53, %v3008_v10 }
 0x8c1   : > { %v5450_v56 = vsub.f32 %v5343_v27, %v2427_v16  ;;  %v2497_v49 = vsel %vm622_vm0, %v2457_v2, 0.0  ;;  %v2491_v27 = vsel %vm622_vm0, %v2455_v52, 0.0  ;;  %4015 = vrcp.f32 %v2881_v31  ;;  %v5511_v31 = vld [vmem:[%s5753_s12 + $0x1] ss:$0 sm:$0xff] }
 0x8c2   : > { %2489 = vadd.xlane.f32.xlu1 %v2488_v6  ;;  %2498 = vadd.xlane.f32.xlu0 %v2497_v49  ;;  %v2506_v9 = vsel %vm622_vm0, %v2460_v15, 0.0  ;;  %4017 = vrcp.f32 %v2882_v36  ;;  %v5492_v51 = vpop.permute.xlu0 %2698 }
 0x8c3   : > { %v2459_v21 = vmul.f32 %v5450_v56, %v5450_v56  ;;  %v5494_v0 = vpop.permute.xlu1 %2726 }
 0x8c5   : > { %v2503_v30 = vsel %vm622_vm0, %v2459_v21, 0.0 }
 0x8c6   : > { %2486 = vadd.xlane.f32.xlu1 %v2485_v26  ;;  %2504 = vadd.xlane.f32.xlu0 %v2503_v30  ;;  %v5496_v17 = vpop.permute.xlu0 %2677 }
 0x8c7   : > { %v5498_v42 = vpop.permute.xlu1 %2733 }
 0x8ca   : > { %2492 = vadd.xlane.f32.xlu1 %v2491_v27  ;;  %v5500_v55 = vpop.permute.xlu0 %2684  ;;  %v5505_v27 = vld [vmem:[%s5715_s10 + $0x1] ss:$0 sm:$0xff] }
 0x8cb   : > { %v4016_v58 = vpop.eup %4015 }
 0x8cc   : > { %v4018_v62 = vpop.eup %4017 }
 0x8ce   : > { %2507 = vadd.xlane.f32.xlu1 %v2506_v9 }
 0x8dc   : > { %2691 = vbcast.lane.b32.xlu0 %v2689_v60, 256 }
 0x8df   : > { %2740 = vbcast.lane.b32.xlu1 %v5247_v5, 256  ;;  %v3854_v5 = vpack.c.bf16 %v3007_v7, %v3006_v37 }
 0x8e0   : > { %2887 = vperm.xlu0 %3981, %v4016_v58  }
 0x8e1   : > { %3855 = vmatprep.subr.bf16.mxu1 %v3854_v5 }
 0x8e2   : > { %3857 = vmatpush3.bf16.msra.mxu1 %v3854_v5 }
 0x8e3   : > { %2747 = vbcast.lane.b32.xlu1 %v2745_v24, 256  ;;  %3859 = vmatprep.subr.bf16.mxu1 %v3858_v57 }
 0x8e4   : > { %2891 = vperm.xlu0 %3981, %v4018_v62  }
 0x8e6   : > { %3861 = vmatpush3.bf16.msra.mxu1 %v3858_v57 }
 0x8e7   : > { %2944 = vperm.xlu1 %3982, %v2941_v41  }
 0x8e8   : > { %2947 = vperm.xlu0 %3981, %v2942_v61  }
 0x933   : > { %v2466_v13 = vpop.xlane.xlu1 %2465 }
 0x934   : > { %v2510_v12 = vmul.f32 0.03125, %v2466_v13 }
 0x936   : > { %v2526_v40 = vadd.f32 1e-05, %v2510_v12 }
 0x937   : > { %v2463_v25 = vpop.xlane.xlu1 %2462 }
 0x938   : > { %4019 = vrsqrt.f32 %v2526_v40  ;;  %v2509_v3 = vmul.f32 0.03125, %v2463_v25  ;;  %v2469_v16 = vpop.xlane.xlu0 %2468 }
 0x939   : > { %v2511_v2 = vmul.f32 0.03125, %v2469_v16 }
 0x93a   : > { %v2525_v6 = vadd.f32 1e-05, %v2509_v3 }
 0x93b   : > { %v2527_v43 = vadd.f32 1e-05, %v2511_v2  ;;  %v2472_v19 = vpop.xlane.xlu1 %2471 }
 0x93c   : > { %4021 = vrsqrt.f32 %v2525_v6  ;;  %v2512_v49 = vmul.f32 0.03125, %v2472_v19 }
 0x93d   : > { %4023 = vrsqrt.f32 %v2527_v43 }
 0x93e   : > { %v2528_v21 = vadd.f32 1e-05, %v2512_v49 }
 0x93f   : > { %v2478_v26 = vpop.xlane.xlu1 %2477 }
 0x940   : > { %4025 = vrsqrt.f32 %v2528_v21  ;;  %v2514_v30 = vmul.f32 0.03125, %v2478_v26 }
 0x942   : > { %v4020_v52 = vpop.eup %4019  ;;  %v2530_v15 = vadd.f32 1e-05, %v2514_v30 }
 0x943   : > { %v2558_v29 = vmul.f32 %v4020_v52, %v5371_v1  ;;  %v2475_v9 = vpop.xlane.xlu1 %2474 }
 0x944   : > { %4027 = vrsqrt.f32 %v2530_v15  ;;  %v2513_v46 = vmul.f32 0.03125, %v2475_v9 }
 0x945   : > { %v2582_v36 = vmul.f32 %v5505_v27, %v2558_v29 }
 0x946   : > { %v4022_v18 = vpop.eup %4021  ;;  %v2529_v60 = vadd.f32 1e-05, %v2513_v46 }
 0x947   : > { %v4024_v58 = vpop.eup %4023  ;;  %v2606_v62 = vadd.f32 %v5511_v31, %v2582_v36  ;;  %v2557_v24 = vmul.f32 %v4022_v18, %v5374_v63  ;;  %v2484_v41 = vpop.xlane.xlu1 %2483 }
 0x948   : > { %v2496_v61 = vpop.xlane.xlu0 %2495  ;;  %v2559_v1 = vmul.f32 %v4024_v58, %v5385_v45  ;;  %4029 = vrsqrt.f32 %v2529_v60  ;;  %v2516_v37 = vmul.f32 0.03125, %v2484_v41 }
 0x949   : > { %v2520_v7 = vmul.f32 0.03125, %v2496_v61  ;;  %v2750_v5 = vmul.f32 %v5358_v23, %v2606_v62  ;;  %v2581_v10 = vmul.f32 %v5505_v27, %v2557_v24 }
 0x94a   : > { %v4026_v53 = vpop.eup %4025  ;;  %v2583_v57 = vmul.f32 %v5505_v27, %v2559_v1  ;;  %v2532_v13 = vadd.f32 1e-05, %v2516_v37 }
 0x94b   : > { %v2536_v12 = vadd.f32 1e-05, %v2520_v7  ;;  %v2772_v40 = vsel %vm622_vm0, %v2750_v5, 0.0  ;;  %v2605_v63 = vadd.f32 %v5511_v31, %v2581_v10  ;;  %v2560_v25 = vmul.f32 %v4026_v53, %v5379_v8  ;;  %v2481_v3 = vpop.xlane.xlu1 %2480 }
 0x94c   : > { %v2502_v45 = vpop.xlane.xlu0 %2501  ;;  %v2773_v16 = vrot.slane %v2772_v40, 4  ;;  %v2607_v2 = vadd.f32 %v5511_v31, %v2583_v57  ;;  %4031 = vrsqrt.f32 %v2532_v13  ;;  %v2515_v23 = vmul.f32 0.03125, %v2481_v3 }
 0x94d   : > { %v2749_v6 = vmul.f32 %v5362_v11, %v2605_v63  ;;  %v2584_v43 = vmul.f32 %v5505_v27, %v2560_v25  ;;  %4033 = vrsqrt.f32 %v2536_v12  ;;  %v2522_v19 = vmul.f32 0.03125, %v2502_v45 }
 0x94e   : > { %v4028_v49 = vpop.eup %4027  ;;  %v2751_v21 = vmul.f32 %v5356_v39, %v2607_v2  ;;  %v2531_v26 = vadd.f32 1e-05, %v2515_v23  ;;  %v2774_v9 = vadd.f32 %v2773_v16, %v2772_v40 }
 0x94f   : > { %v2765_v30 = vsel %vm622_vm0, %v2749_v6, 0.0  ;;  %v2608_v8 = vadd.f32 %v5511_v31, %v2584_v43  ;;  %v2538_v52 = vadd.f32 1e-05, %v2522_v19  ;;  %v2490_v15 = vpop.xlane.xlu1 %2489  ;;  %v2562_v36 = vmul.f32 %v4028_v49, %v5393_v32 }
 0x950   : > { %v2499_v29 = vpop.xlane.xlu0 %2498  ;;  %v2766_v46 = vrot.slane %v2765_v30, 4  ;;  %4035 = vrsqrt.f32 %v2531_v26  ;;  %v2779_v39 = vsel %vm622_vm0, %v2751_v21, 0.0  ;;  %v2518_v58 = vmul.f32 0.03125, %v2490_v15 }
 0x951   : > { %v2752_v11 = vmul.f32 %v5364_v34, %v2608_v8  ;;  %4037 = vrsqrt.f32 %v2538_v52  ;;  %v2521_v62 = vmul.f32 0.03125, %v2499_v29  ;;  %v2775_v37 = vrot.slane %v2774_v9, 2 }
 0x952   : > { %v4030_v18 = vpop.eup %4029  ;;  %v2767_v60 = vadd.f32 %v2766_v46, %v2765_v30  ;;  %v2534_v5 = vadd.f32 1e-05, %v2518_v58  ;;  %v2780_v53 = vrot.slane %v2779_v39, 4  ;;  %v2586_v40 = vmul.f32 %v5505_v27, %v2562_v36 }
 0x953   : > { %v2786_v24 = vsel %vm622_vm0, %v2752_v11, 0.0  ;;  %v2561_v41 = vmul.f32 %v4030_v18, %v5397_v50  ;;  %v2487_v61 = vpop.xlane.xlu1 %2486  ;;  %v2537_v10 = vadd.f32 1e-05, %v2521_v62  ;;  %v2776_v2 = vadd.f32 %v2775_v37, %v2774_v9 }
 0x954   : > { %v2505_v1 = vpop.xlane.xlu0 %2504  ;;  %v2787_v7 = vrot.slane %v2786_v24, 4  ;;  %v2768_v34 = vrot.slane %v2767_v60, 2  ;;  %v2517_v57 = vmul.f32 0.03125, %v2487_v61  ;;  %4039 = vrsqrt.f32 %v2534_v5 }
 0x955   : > { %v2585_v32 = vmul.f32 %v5505_v27, %v2561_v41  ;;  %v2523_v63 = vmul.f32 0.03125, %v2505_v1  ;;  %4041 = vrsqrt.f32 %v2537_v10  ;;  %v2781_v30 = vadd.f32 %v2780_v53, %v2779_v39 }
 0x956   : > { %v4032_v13 = vpop.eup %4031  ;;  %v2788_v12 = vadd.f32 %v2787_v7, %v2786_v24  ;;  %v2533_v3 = vadd.f32 1e-05, %v2517_v57  ;;  %v2769_v19 = vadd.f32 %v2768_v34, %v2767_v60  ;;  %v2777_v58 = vrot.slane %v2776_v2, 1 }
 0x957   : > { %v4034_v25 = vpop.eup %4033  ;;  %v2609_v50 = vadd.f32 %v5511_v31, %v2585_v32  ;;  %v2493_v45 = vpop.xlane.xlu1 %2492  ;;  %v2564_v16 = vmul.f32 %v4032_v13, %v5403_v38  ;;  %v2539_v6 = vadd.f32 1e-05, %v2523_v63  ;;  %v2610_v38 = vadd.f32 %v5511_v31, %v2586_v40 }
 0x958   : > { %v2568_v23 = vmul.f32 %v4034_v25, %v5412_v47  ;;  %v2519_v43 = vmul.f32 0.03125, %v2493_v45  ;;  %4043 = vrsqrt.f32 %v2533_v3  ;;  %v2789_v46 = vrot.slane %v2788_v12, 2  ;;  %v2692_v36 = vpop.permute.xlu0 %2691 }
 0x959   : > { %v2753_v49 = vmul.f32 %v5368_v4, %v2609_v50  ;;  %v2588_v21 = vmul.f32 %v5505_v27, %v2564_v16  ;;  %4045 = vrsqrt.f32 %v2539_v6  ;;  %v2770_v39 = vrot.slane %v2769_v19, 1 }
 0x95a   : > { %v4036_v26 = vpop.eup %4035  ;;  %v2592_v8 = vmul.f32 %v5505_v27, %v2568_v23  ;;  %v2535_v52 = vadd.f32 1e-05, %v2519_v43  ;;  %v2790_v61 = vadd.f32 %v2789_v46, %v2788_v12  ;;  %v2782_v1 = vrot.slane %v2781_v30, 2 }
 0x95b   : > { %v4038_v15 = vpop.eup %4037  ;;  %v2563_v29 = vmul.f32 %v4036_v26, %v5409_v28  ;;  %v2612_v47 = vadd.f32 %v5511_v31, %v2588_v21  ;;  %v2508_v9 = vpop.xlane.xlu1 %2507  ;;  %v2793_v62 = vsel %vm622_vm0, %v2753_v49, 0.0  ;;  %v2754_v53 = vmul.f32 %v5496_v17, %v2610_v38 }
 0x95c   : > { %v2616_v4 = vadd.f32 %v5511_v31, %v2592_v8  ;;  %v2570_v11 = vmul.f32 %v4038_v15, %v5423_v44  ;;  %4047 = vrsqrt.f32 %v2535_v52  ;;  %v2524_v18 = vmul.f32 0.03125, %v2508_v9 }
 0x95d   : > { %v2756_v60 = vmul.f32 %v2692_v36, %v2612_v47  ;;  %v2587_v37 = vmul.f32 %v5505_v27, %v2563_v29  ;;  %v2794_v44 = vrot.slane %v2793_v62, 4  ;;  %v5555_v57 = vadd.f32 %v2770_v39, %v2769_v19 }
 0x95e   : > { %v2760_v24 = vmul.f32 %v5490_v14, %v2616_v4  ;;  %v2594_v28 = vmul.f32 %v5505_v27, %v2570_v11  ;;  %v2540_v41 = vadd.f32 1e-05, %v2524_v18  ;;  %v4040_v5 = vpop.eup %4039  ;;  %v5560_v63 = vadd.f32 %v2777_v58, %v2776_v2 }
 0x95f   : > { %v2814_v7 = vsel %vm622_vm0, %v2756_v60, 0.0  ;;  %v4042_v34 = vpop.eup %4041  ;;  %v2566_v14 = vmul.f32 %v4040_v5, %v5420_v54  ;;  %v5558_v40 = vpop.permute.xlu0 %2887  ;;  %v2791_v25 = vrot.slane %v2790_v61, 1  ;;  %v2611_v3 = vadd.f32 %v5511_v31, %v2587_v37 }
 0x960   : > { %v2815_v10 = vrot.slane %v2814_v7, 4  ;;  %4049 = vrsqrt.f32 %v2540_v41  ;;  %v2842_v32 = vsel %vm622_vm0, %v2760_v24, 0.0  ;;  %v2618_v13 = vadd.f32 %v5511_v31, %v2594_v28  ;;  %v2741_v39 = vpop.permute.xlu1 %2740 }
 0x961   : > { %v2590_v45 = vmul.f32 %v5505_v27, %v2566_v14  ;;  %v2795_v17 = vadd.f32 %v2794_v44, %v2793_v62  ;;  %v5564_v16 = vadd.f32 %v2782_v1, %v2781_v30  ;;  %v2843_v54 = vrot.slane %v2842_v32, 4 }
 0x962   : > { %v2816_v12 = vadd.f32 %v2815_v10, %v2814_v7  ;;  %v4044_v50 = vpop.eup %4043  ;;  %v2569_v6 = vmul.f32 %v4042_v34, %v5437_v33  ;;  %v2893_v21 = vrot.slane %v5558_v40, 1  ;;  %v2894_v26 = vrot.slane %v5558_v40, 2 }
 0x963   : > { %v4046_v23 = vpop.eup %4045  ;;  %v2565_v43 = vmul.f32 %v4044_v50, %v5432_v48  ;;  %v2614_v49 = vadd.f32 %v5511_v31, %v2590_v45  ;;  %v5573_v52 = vmul.f32 %v5498_v42, %v2618_v13  ;;  %v5576_v15 = vadd.f32 %v2791_v25, %v2790_v61  ;;  %v5599_v34 = vpop.permute.xlu0 %2891 }
 0x964   : > { %v2817_v19 = vrot.slane %v2816_v12, 2  ;;  %v2571_v2 = vmul.f32 %v4046_v23, %v5450_v56  ;;  %v2796_v33 = vrot.slane %v2795_v17, 2  ;;  %v5581_v47 = vadd.f32 %v2843_v54, %v2842_v32 }
 0x965   : > { %v2589_v30 = vmul.f32 %v5505_v27, %v2565_v43  ;;  %v2758_v48 = vmul.f32 %v5360_v59, %v2614_v49  ;;  %v2593_v9 = vmul.f32 %v5505_v27, %v2569_v6  ;;  %v2755_v42 = vmul.f32 %v5500_v55, %v2611_v3 }
 0x966   : > { %v4048_v8 = vpop.eup %4047  ;;  %v2818_v29 = vadd.f32 %v2817_v19, %v2816_v12  ;;  %v2595_v56 = vmul.f32 %v5505_v27, %v2571_v2  ;;  %v2784_v59 = vrot.slane %v5564_v16, 1  ;;  %v2797_v58 = vadd.f32 %v2796_v33, %v2795_v17 }
 0x967   : > { %v2567_v38 = vmul.f32 %v4048_v8, %v5447_v20  ;;  %v2613_v46 = vadd.f32 %v5511_v31, %v2589_v30  ;;  %v2828_v4 = vsel %vm622_vm0, %v2758_v48, 0.0  ;;  %v2800_v62 = vsel %vm622_vm0, %v2754_v53, 0.0 }
 0x968   : > { %v2619_v36 = vadd.f32 %v5511_v31, %v2595_v56  ;;  %v2829_v18 = vrot.slane %v2828_v4, 4  ;;  %v2819_v28 = vrot.slane %v2818_v29, 1  ;;  %v2801_v37 = vrot.slane %v2800_v62, 4 }
 0x969   : > { %v2591_v11 = vmul.f32 %v5505_v27, %v2567_v38  ;;  %v2757_v60 = vmul.f32 %v5492_v51, %v2613_v46  ;;  %v2807_v7 = vsel %vm622_vm0, %v2755_v42, 0.0  ;;  %v2798_v32 = vrot.slane %v2797_v58, 1 }
 0x96a   : > { %v4050_v20 = vpop.eup %4049  ;;  %v2763_v55 = vmul.f32 %v2741_v39, %v2619_v36  ;;  %v2830_v61 = vadd.f32 %v2829_v18, %v2828_v4  ;;  %v2802_v14 = vadd.f32 %v2801_v37, %v2800_v62  ;;  %v2808_v13 = vrot.slane %v2807_v7, 4 }
 0x96b   : > { %v2615_v24 = vadd.f32 %v5511_v31, %v2591_v11  ;;  %v2572_v41 = vmul.f32 %v4050_v20, %v5456_v22  ;;  %v2821_v1 = vsel %vm622_vm0, %v2757_v60, 0.0  ;;  %v2617_v3 = vadd.f32 %v5511_v31, %v2593_v9 }
 0x96c   : > { %v2822_v44 = vrot.slane %v2821_v1, 4  ;;  %v2863_v51 = vsel %vm622_vm0, %v2763_v55, 0.0  ;;  %v2831_v22 = vrot.slane %v2830_v61, 2  ;;  %v2900_v17 = vrot.slane %v5599_v34, 1 }
 0x96d   : > { %v2759_v5 = vmul.f32 %v5366_v35, %v2615_v24  ;;  %v2596_v10 = vmul.f32 %v5505_v27, %v2572_v41  ;;  %v2864_v53 = vrot.slane %v2863_v51, 4  ;;  %v2748_v35 = vpop.permute.xlu1 %2747  ;;  %v2803_v27 = vrot.slane %v2802_v14, 2 }
 0x96e   : > { %v2823_v12 = vadd.f32 %v2822_v44, %v2821_v1  ;;  %v2785_v6 = vadd.f32 %v2784_v59, %v5564_v16  ;;  %v2809_v43 = vadd.f32 %v2808_v13, %v2807_v7  ;;  %v2820_v49 = vadd.f32 %v2819_v28, %v2818_v29 }
 0x96f   : > { %v2835_v25 = vsel %vm622_vm0, %v2759_v5, 0.0  ;;  %v2620_v50 = vadd.f32 %v5511_v31, %v2596_v10  ;;  %v2865_v23 = vadd.f32 %v2864_v53, %v2863_v51  ;;  %v2799_v2 = vadd.f32 %v2798_v32, %v2797_v58 }
 0x970   : > { %v2836_v45 = vrot.slane %v2835_v25, 4  ;;  %v2824_v19 = vrot.slane %v2823_v12, 2  ;;  %v2804_v8 = vadd.f32 %v2803_v27, %v2802_v14  ;;  %v2832_v30 = vadd.f32 %v2831_v22, %v2830_v61 }
 0x971   : > { %v2764_v54 = vmul.f32 %v2748_v35, %v2620_v50  ;;  %v2810_v33 = vrot.slane %v2809_v43, 2  ;;  %v2895_v48 = vrot.slane %v5558_v40, 3  ;;  %v2896_v46 = vrot.slane %v5558_v40, 4 }
 0x972   : > { %v2837_v38 = vadd.f32 %v2836_v45, %v2835_v25  ;;  %v2805_v9 = vrot.slane %v2804_v8, 1  ;;  %v2866_v16 = vrot.slane %v2865_v23, 2  ;;  %v2897_v29 = vrot.slane %v5558_v40, 5 }
 0x973   : > { %v2870_v31 = vsel %vm622_vm0, %v2764_v54, 0.0  ;;  %v2811_v42 = vadd.f32 %v2810_v33, %v2809_v43  ;;  %v2924_v4 = vmul.f32 %v2893_v21, %v5560_v63  ;;  %v2825_v11 = vadd.f32 %v2824_v19, %v2823_v12 }
 0x974   : > { %v2871_v56 = vrot.slane %v2870_v31, 4  ;;  %v2806_v59 = vadd.f32 %v2805_v9, %v2804_v8  ;;  %v2925_v20 = vmul.f32 %v2894_v26, %v2785_v6  ;;  %v2898_v60 = vrot.slane %v5558_v40, 6 }
 0x975   : > { %v2812_v18 = vrot.slane %v2811_v42, 1  ;;  %v2926_v39 = vmul.f32 %v2895_v48, %v5576_v15  ;;  %v2927_v58 = vmul.f32 %v2896_v46, %v2799_v2  ;;  %v2838_v62 = vrot.slane %v2837_v38, 2 }
 0x976   : > { %v2872_v36 = vadd.f32 %v2871_v56, %v2870_v31  ;;  %v2899_v28 = vrot.slane %v5558_v40, 7  ;;  %v2923_v63 = vmul.f32 %v5558_v40, %v5555_v57  ;;  %v2928_v55 = vmul.f32 %v2897_v29, %v2806_v59 }
 0x977   : > { %v2813_v21 = vadd.f32 %v2812_v18, %v2811_v42  ;;  %v2967_v41 = vrot.slane %v2924_v4, 7  ;;  %v2970_v61 = vrot.slane %v2925_v20, 6  ;;  %v2761_v1 = vmul.f32 %v5494_v0, %v2617_v3  ;;  %v2945_v0 = vpop.permute.xlu1 %2944 }
 0x978   : > { %v2873_v24 = vrot.slane %v2872_v36, 2  ;;  %v2867_v26 = vadd.f32 %v2866_v16, %v2865_v23  ;;  %v2930_v37 = vmul.f32 %v2899_v28, %v2820_v49  ;;  %v2976_v7 = vrot.slane %v2927_v58, 4 }
 0x979   : > { %v2929_v44 = vmul.f32 %v2898_v60, %v2813_v21  ;;  %v2969_v15 = vsel %vm2968_vm7, %v2967_v41, %v2923_v63  ;;  %v2973_v5 = vrot.slane %v2926_v39, 5  ;;  %v2833_v51 = vrot.slane %v2832_v30, 1 }
 0x97a   : > { %v2874_v10 = vadd.f32 %v2873_v24, %v2872_v36  ;;  %v2972_v53 = vsel %vm2971_vm8, %v2970_v61, %v2969_v15  ;;  %v2839_v32 = vadd.f32 %v2838_v62, %v2837_v38  ;;  %v2845_v57 = vrot.slane %v5581_v47, 2 }
 0x97b   : > { %v2975_v40 = vsel %vm2974_vm9, %v2973_v5, %v2972_v53  ;;  %v2979_v14 = vrot.slane %v2928_v55, 3  ;;  %v2982_v13 = vrot.slane %v2929_v44, 2  ;;  %v2826_v22 = vrot.slane %v2825_v11, 1 }
 0x97c   : > { %v2978_v12 = vsel %vm2977_vm10, %v2976_v7, %v2975_v40  ;;  %v2985_v25 = vrot.slane %v2930_v37, 1  ;;  %v2840_v50 = vrot.slane %v2839_v32, 1  ;;  %v2846_v3 = vadd.f32 %v2845_v57, %v5581_v47 }
 0x97d   : > { %v2981_v45 = vsel %vm2980_vm11, %v2979_v14, %v2978_v12  ;;  %v2834_v35 = vadd.f32 %v2833_v51, %v2832_v30  ;;  %v2849_v27 = vsel %vm622_vm0, %v2761_v1, 0.0  ;;  %v2856_v23 = vsel %vm622_vm0, %v5573_v52, 0.0 }
 0x97e   : > { %v2984_v54 = vsel %vm2983_vm12, %v2982_v13, %v2981_v45  ;;  %v2841_v6 = vadd.f32 %v2840_v50, %v2839_v32  ;;  %v2847_v43 = vrot.slane %v2846_v3, 1  ;;  %v2850_v19 = vrot.slane %v2849_v27, 4  ;;  %v2948_v32 = vpop.permute.xlu0 %2947  ;;  %v3407_v13 = vld [vmem:[%s5756_s1] ss:$0 sm:$0xff]  ;;  %s4255_s1 = scalar_lea.vmem %s4254_s21, 512 }
 0x97f   : > { %vm2949_vm14 = vcmp.eq.s32.totalorder %v2945_v0, 1  ;;  %v2987_v49 = vsel %vm2986_vm13, %v2985_v25, %v2984_v54  ;;  %v2827_v2 = vadd.f32 %v2826_v22, %v2825_v11  ;;  %v2857_v8 = vrot.slane %v2856_v23, 4  ;;  %p4257_p2 = scmp.lt.s32.totalorder %s4255_s1, %s4249_s6 }
 0x980   : > { %v2901_v47 = vrot.slane %v5599_v34, 2  ;;  %v3004_v31 = vsel %vm2949_vm14, %v2987_v49, 0.0  ;;  %v2851_v33 = vadd.f32 %v2850_v19, %v2849_v27  ;;  %v2875_v30 = vrot.slane %v2874_v10, 1 }
 0x981   : > { %v2848_v48 = vadd.f32 %v2847_v43, %v2846_v3  ;;  %v2858_v38 = vadd.f32 %v2857_v8, %v2856_v23  ;;  %v2932_v52 = vmul.f32 %v2900_v17, %v2834_v35  ;;  %3795 = vmatprep.mubr.msk.f32.mxu1 %vm622_vm0, %v3004_v31  ;;  %v2868_v56 = vrot.slane %v2867_v26, 1  ;;  %p4258_p8 = por %p4257_p2, %p4256_p0 }
 0x982   : > { %v2852_v9 = vrot.slane %v2851_v33, 2  ;;  %v2933_v46 = vmul.f32 %v2901_v47, %v2841_v6  ;;  %v2902_v42 = vrot.slane %v5599_v34, 3  ;;  %v2931_v29 = vmul.f32 %v5599_v34, %v2827_v2 }
 0x983   : > { %v2859_v16 = vrot.slane %v2858_v38, 2  ;;  %v2876_v36 = vadd.f32 %v2875_v30, %v2874_v10  ;;  %v2988_v18 = vrot.slane %v2932_v52, 7  ;;  %v2869_v60 = vadd.f32 %v2868_v56, %v2867_v26  ;;  %p4259_p10 = pnand %p4258_p8, %p4252_p13 }
 0x984   : > { %v2853_v4 = vadd.f32 %v2852_v9, %v2851_v33  ;;  %v2990_v11 = vrot.slane %v2933_v46, 6  ;;  %v2934_v20 = vmul.f32 %v2902_v42, %v2848_v48  ;;  %v2906_v17 = vrot.slane %v5599_v34, 7 }
 0x985   : > { %v2860_v59 = vadd.f32 %v2859_v16, %v2858_v38  ;;  %v2989_v62 = vsel %vm2968_vm7, %v2988_v18, %v2931_v29  ;;  %v2903_v28 = vrot.slane %v5599_v34, 4  ;;  %v2905_v63 = vrot.slane %v5599_v34, 6 }
 0x986   : > { %v2854_v39 = vrot.slane %v2853_v4, 1  ;;  %v2991_v21 = vsel %vm2971_vm8, %v2990_v11, %v2989_v62  ;;  %v2904_v41 = vrot.slane %v5599_v34, 5  ;;  %v2938_v61 = vmul.f32 %v2906_v17, %v2876_v36 }
 0x987   : > { %v2861_v58 = vrot.slane %v2860_v59, 1  ;;  %v2992_v1 = vrot.slane %v2934_v20, 5  ;;  %v2937_v26 = vmul.f32 %v2905_v63, %v2869_v60  ;;  %vm2950_vm15 = vcmp.eq.s32.totalorder %v2948_v32, 1 }
 0x988   : > { %v2855_v24 = vadd.f32 %v2854_v39, %v2853_v4  ;;  %v3000_v51 = vrot.slane %v2938_v61, 1 }
 0x989   : > { %v2862_v55 = vadd.f32 %v2861_v58, %v2860_v59  ;;  %v2993_v44 = vsel %vm2974_vm9, %v2992_v1, %v2991_v21  ;;  %v2998_v53 = vrot.slane %v2937_v26, 2 }
 0x98a   : > { %v2935_v37 = vmul.f32 %v2903_v28, %v2855_v24 }
 0x98b   : > { %v2936_v7 = vmul.f32 %v2904_v41, %v2862_v55 }
 0x98c   : > { %v2994_v15 = vrot.slane %v2935_v37, 4 }
 0x98d   : > { %v2996_v5 = vrot.slane %v2936_v7, 3 }
 0x98e   : > { %v2995_v10 = vsel %vm2977_vm10, %v2994_v15, %v2993_v44 }
 0x98f   : > { %v2997_v57 = vsel %vm2980_vm11, %v2996_v5, %v2995_v10 }
 0x990   : > { %v2999_v34 = vsel %vm2983_vm12, %v2998_v53, %v2997_v57 }
 0x991   : > { %v3001_v40 = vsel %vm2986_vm13, %v3000_v51, %v2999_v34 }
 0x992   : > { %v3005_v14 = vsel %vm2950_vm15, %v3001_v40, 0.0 }
 0x993   : > { %3796 = vmatmul.mubr.msk.f32.vlgmr.msra.gmra.mrb[54].mxu1 %vm622_vm0, %v3005_v14 }
 0xa66   : > { %v3797_v22 = vpop.f32.mrb[54].mxu1 }
 0xa67   : > { %v3095_v0 = vadd.f32 %v3797_v22, %v3407_v13  ;;  %v3089_v12 = vpop.f32.mrb[55].mxu1 }
 0xa68   : > { %v3090_v25 = vadd.f32 %v3407_v13, %v3089_v12 }
 0xa69   : > { %3099 = vst [vmem:[%s586_s20 + $0x8] sm:$0xff] %v3095_v0 }
 0xa6a   : > { %3098 = vst [vmem:[%s586_s20] sm:$0xff] %v3090_v25 }
 0xa6b   : > { %4262 = shalt.err (!%p4259_p10)
}
 0xa6c   : > { %s4263_s20 = scalar_lea.hbm %s5661_s11, 256  ;;  %s4267_s24 = scalar_lea.hbm %s5757_s3, 512 }
 0xa6d   : > { %p4264_p11 = scmp.ne.s32.totalorder %s5661_s11, %s4263_s20  ;;  %p4268_p5 = scmp.lt.u32.totalorder %s5661_s11, %s5757_s3 }
 0xa6e   : > { %p4269_p7 = scmp.lt.u32.totalorder %s4267_s24, %s4263_s20  ;;  %p4271_p9 = scmp.lt.u32.totalorder %s4263_s20, %s5661_s11 }
 0xa6f   : > { %p4265_p12 = pnand %p4264_p11, %p5758_p4 }
 0xa70   : > { %p4270_p6 = por %p4269_p7, %p4268_p5 }
 0xa71   : > { %p4266_p3 = pneg %p4265_p12 }
 0xa72   : > { %p4272_p1 = por %p4271_p9, %p4270_p6 }
 0xa74   : > { %p4273_p13 = pnand %p4272_p1, %p4266_p3 }
 0xa76   : > { %4276 = shalt.err (!%p4273_p13)
}
 0xa77   : > { %s4343_s6 = smov 128   ;;  %s4344_s1 = smov 8  }
 0xa78   : > { %3892 = dma.vmem_to_hbm [thread:$0]  (%p5758_p4), %s5656_s28, 256, %s5661_s11, %s3101_s25, %s4343_s6, %s4343_s6, %s4344_s1  }
 0xa79 PF: > { %s3129_s13 = sand.u32 1, %s4315_s29   ;;  %p5759_p0 = scmp.ne.s32.totalorder %s5743_s26, 0 }
 0xa7a   : > { %p5760_p2 = scmp.ge.s32.totalorder %s4327_s16, 2  ;;  %s3130_s20 = scalar_lea.sflag [#allocation4], %s3129_s13 }
 0xa7c   : > { %p3918_p8 = pnand %p5760_p2, %p5759_p0 }
 0xa7e   : > { %4310 = dma.done.wait (!%p3918_p8), %s3130_s20, 256  }
 0xa7f   : > { %4312 = vsyncadd (!%p3918_p8), %s3130_s20, 4294967040  ;;  %p30_p10 = scmp.ge.s32.totalorder %s4606_s23, 4   ;;  %s5761_s29 = smov %s4319_s30 }
 0xa80   : > { %s5762_s30 = smov %s4323_s15  ;;  %s5763_s15 = smov %s4617_s17 }
 0xa81   : > { %s5764_s16 = smov %s4606_s23  ;;  %32 = sbr.rel (!%p30_p10) target bundleno = 16 (0x10), region = 156 }
 0xa88   :  { %3135 = vsyncpa [#allocation3], 1 }
 0xa89   :  { %3137 = vsyncpa [#allocation3 + $0x1], 1 }
 0xa8a   :  { %3138 = vsyncpa [#allocation6], 1 }
 0xa8b   :  { %3139 = vsyncpa [#allocation9], 1 }
 0xa8c   :  { %3140 = vsyncpa [#allocation12], 1 }
 0xa8d   :  { %3141 = vsyncpa [#allocation4], 1 }
 0xa8e   :  { %3143 = vsyncpa [#allocation4 + $0x1], 1 }

</bundles_post_ra>
